<compile_context>
chip_gen: v7x
topology: tpu7x:2x2x1
jax: 0.10.0
libtpu: 0.0.40
codegen_flags: <defaults>
</compile_context>

<pallas_src>
import functools

import jax
import jax.numpy as jnp
from jax import lax
from jax.experimental import pallas as pl
from jax.experimental.pallas import tpu as pltpu


_LANE = 128      # per-gate / output padded lane width (one full lane tile)
_SUBLANE = 8     # padded batch rows (one full sublane tile)


def _lstm_kernel(x_ref, w_ih_ref, w_hh_ref, b_ref, w_fc_ref, b_fc_ref,
                 out_ref, xproj_ref, *, T, Bp, Hp):
    # ---- Hoisted input projection (no sequential dependency): one tall bf16
    # MXU matmul with f32 accumulation.
    #   x_ref: (T*Bp, I) bf16, w_ih_ref: (I, 4Hp) bf16, b_ref: (1, 4Hp) f32
    #   -> xproj scratch (T*Bp, 4Hp) f32
    xproj_ref[...] = (
        jnp.dot(x_ref[...], w_ih_ref[...], preferred_element_type=jnp.float32)
        + b_ref[...])

    h0 = jnp.zeros((Bp, Hp), jnp.float32)
    c0 = jnp.zeros((Bp, Hp), jnp.float32)

    def step(t, carry):
        h, c = carry
        # Aligned, unmasked full-tile load: start is a multiple of 8 sublanes.
        row0 = pl.multiple_of(t * Bp, _SUBLANE)
        xp_t = xproj_ref[pl.ds(row0, Bp), :]                    # (Bp, 4Hp) f32
        # Serial critical path: h @ W_hh^T (bf16 operands, f32 accumulation).
        gates = xp_t + jnp.dot(h.astype(w_hh_ref.dtype), w_hh_ref[...],
                               preferred_element_type=jnp.float32)
        # Gate column layout from the wrapper: [ i | f | o | g ], each Hp lanes
        # wide -> lane-aligned slices; one sigmoid push over the 3*Hp slab,
        # one tanh push for g.
        sig = jax.nn.sigmoid(gates[:, :3 * Hp])
        i_g = sig[:, 0 * Hp:1 * Hp]
        f_g = sig[:, 1 * Hp:2 * Hp]
        o_g = sig[:, 2 * Hp:3 * Hp]
        g_g = jnp.tanh(gates[:, 3 * Hp:4 * Hp])
        c_new = f_g * c + i_g * g_g
        h_new = o_g * jnp.tanh(c_new)
        return h_new, c_new

    # Partial unroll: keeps LLO scheduling visibility (hides EUP/MXU latency)
    # without full-unroll code-size blowup at large T.
    h_last, _ = lax.fori_loop(0, T, step, (h0, c0),
                              unroll=max(1, min(T, 8)))

    # FC head on the last hidden state (lane-dense, full-tile store).
    out_ref[...] = (
        jnp.dot(h_last.astype(w_fc_ref.dtype), w_fc_ref[...],
                preferred_element_type=jnp.float32)
        + b_fc_ref[...]).astype(out_ref.dtype)


def pack_lstm_params(params):
    """One-time parameter packing: gate reorder to [i|f|o|g], transpose to
    right-multiply form, lane padding to Hp/Op, bias fusion, bf16 cast for
    MXU operands.  Call once per parameter set and reuse the result."""
    w_ih, w_hh, b_ih, b_hh, w_fc, b_fc = params
    H = w_hh.shape[1]
    I = w_ih.shape[1]
    O = w_fc.shape[0]
    Hp = ((H + _LANE - 1) // _LANE) * _LANE          # per-gate padded width
    Op = ((O + _LANE - 1) // _LANE) * _LANE          # padded output width

    f32, bf16 = jnp.float32, jnp.bfloat16

    def pack_gates(blocks, rows, rows_padded):
        # blocks: per-gate (rows, H) matrices already ordered [i, f, o, g].
        # Padded rows/cols are exact zeros (exact in bf16 too) -- required so
        # padded lanes of h/c stay exactly 0 through the recurrence.
        return jnp.concatenate(
            [jnp.pad(blk, ((0, rows_padded - rows), (0, Hp - H)))
             for blk in blocks], axis=1)

    # PyTorch packs gate rows as [i, f, g, o]; reorder columns to [i, f, o, g].
    wi, wf, wg, wo = jnp.split(w_ih.astype(f32), 4, axis=0)      # (H, I) each
    w_ih_t = pack_gates([wi.T, wf.T, wo.T, wg.T], I, I).astype(bf16)   # (I,4Hp)

    ui, uf, ug, uo = jnp.split(w_hh.astype(f32), 4, axis=0)      # (H, H) each
    w_hh_t = pack_gates([ui.T, uf.T, uo.T, ug.T], H, Hp).astype(bf16)  # (Hp,4Hp)

    b_fused = (b_ih + b_hh).astype(f32)                          # (4H,)
    bi, bff, bg, bo = jnp.split(b_fused, 4)
    b_packed = jnp.concatenate(
        [jnp.pad(v, (0, Hp - H)) for v in (bi, bff, bo, bg)]).reshape(1, 4 * Hp)

    w_fc_t = jnp.pad(w_fc.astype(f32).T,
                     ((0, Hp - H), (0, Op - O))).astype(bf16)    # (Hp, Op)
    b_fc_p = jnp.pad(b_fc.astype(f32), (0, Op - O)).reshape(1, Op)

    dims = {"I": I, "H": H, "O": O, "Hp": Hp, "Op": Op}
    return (w_ih_t, w_hh_t, b_packed, w_fc_t, b_fc_p), dims


def lstm_forward_packed(x, packed, dims):
    """x: (B, T, I) batch-first. Returns (B, O) float32."""
    w_ih_t, w_hh_t, b_packed, w_fc_t, b_fc_p = packed
    B, T, I = x.shape
    Hp, Op, O = dims["Hp"], dims["Op"], dims["O"]
    Bp = ((B + _SUBLANE - 1) // _SUBLANE) * _SUBLANE

    # Time-major, batch padded to a full sublane tile; the bf16 cast is fused
    # with the transpose (single pass over x).
    xt = jnp.pad(jnp.transpose(x, (1, 0, 2)).astype(jnp.bfloat16),
                 ((0, 0), (0, Bp - B), (0, 0)))                  # (T, Bp, I)
    x2d = xt.reshape(T * Bp, I)

    kernel = functools.partial(_lstm_kernel, T=T, Bp=Bp, Hp=Hp)

    grid_spec = pltpu.PrefetchScalarGridSpec(
        num_scalar_prefetch=0,
        grid=(1,),  # whole recurrence lives in one invocation
        in_specs=[
            pl.BlockSpec((T * Bp, I), lambda i: (0, 0)),      # x (time-major)
            pl.BlockSpec((I, 4 * Hp), lambda i: (0, 0)),      # W_ih^T [i|f|o|g]
            pl.BlockSpec((Hp, 4 * Hp), lambda i: (0, 0)),     # W_hh^T [i|f|o|g]
            pl.BlockSpec((1, 4 * Hp), lambda i: (0, 0)),      # fused bias
            pl.BlockSpec((Hp, Op), lambda i: (0, 0)),         # W_fc^T
            pl.BlockSpec((1, Op), lambda i: (0, 0)),          # b_fc
        ],
        out_specs=pl.BlockSpec((Bp, Op), lambda i: (0, 0)),   # full-tile store
        scratch_shapes=[
            pltpu.VMEM((T * Bp, 4 * Hp), jnp.float32),        # hoisted x-proj
        ],
    )

    out_padded = pl.pallas_call(
        kernel,
        out_shape=jax.ShapeDtypeStruct((Bp, Op), jnp.float32),
        grid_spec=grid_spec,
        compiler_params=pltpu.CompilerParams(
            dimension_semantics=("arbitrary",),
        ),
    )(x2d, w_ih_t, w_hh_t, b_packed, w_fc_t, b_fc_p)

    return out_padded[:B, :O]


def lstm_model_forward(x, params):
    """Convenience wrapper: pack (once) + forward.  For repeated calls, call
    pack_lstm_params once and reuse lstm_forward_packed."""
    packed, dims = pack_lstm_params(params)
    return lstm_forward_packed(x, packed, dims)


def _ref_forward(x, params):
    """Pure-JAX f32 reference mirroring PyTorch nn.LSTM + nn.Linear."""
    w_ih, w_hh, b_ih, b_hh, w_fc, b_fc = params
    B, T, _ = x.shape
    H = w_hh.shape[1]
    h = jnp.zeros((B, H), jnp.float32)
    c = jnp.zeros((B, H), jnp.float32)
    for t in range(T):
        gates = x[:, t, :] @ w_ih.T + b_ih + h @ w_hh.T + b_hh
        i = jax.nn.sigmoid(gates[:, 0 * H:1 * H])
        f = jax.nn.sigmoid(gates[:, 1 * H:2 * H])
        g = jnp.tanh(gates[:, 2 * H:3 * H])
        o = jax.nn.sigmoid(gates[:, 3 * H:4 * H])
        c = f * c + i * g
        h = o * jnp.tanh(c)
    return h @ w_fc.T + b_fc


if __name__ == "__main__":
    # Small shapes implied by the forward pass.
    B, T, I, H, O = 2, 8, 16, 32, 4

    key = jax.random.PRNGKey(0)
    ks = jax.random.split(key, 7)
    scale = 1.0 / jnp.sqrt(jnp.float32(H))   # matches PyTorch uniform bound

    x = jax.random.normal(ks[0], (B, T, I), jnp.float32)
    w_ih = jax.random.uniform(ks[1], (4 * H, I), jnp.float32, -scale, scale)
    w_hh = jax.random.uniform(ks[2], (4 * H, H), jnp.float32, -scale, scale)
    b_ih = jax.random.uniform(ks[3], (4 * H,), jnp.float32, -scale, scale)
    b_hh = jax.random.uniform(ks[4], (4 * H,), jnp.float32, -scale, scale)
    w_fc = jax.random.uniform(ks[5], (O, H), jnp.float32, -scale, scale)
    b_fc = jax.random.uniform(ks[6], (O,), jnp.float32, -scale, scale)

    params = (w_ih, w_hh, b_ih, b_hh, w_fc, b_fc)

    packed, dims = pack_lstm_params(params)     # one-time param prep
    out = lstm_forward_packed(x, packed, dims)
    jax.block_until_ready(out)

    ref = _ref_forward(x, params)
    assert out.shape == (B, O)
    # bf16 MXU operands vs. an all-f32 reference: tolerance per perf review.
    assert jnp.allclose(out, ref, atol=5e-2, rtol=5e-2), (out, ref)

    print("KERNEL_OK")
</pallas_src>

<mosaic_0001>
module attributes {stable_mosaic.version = 11 : i64} {
  func.func @_lstm_kernel(%arg0: i32, %arg1: memref<64x16xbf16, #tpu.memory_space<vmem>>, %arg2: memref<16x512xbf16, #tpu.memory_space<vmem>>, %arg3: memref<128x512xbf16, #tpu.memory_space<vmem>>, %arg4: memref<1x512xf32, #tpu.memory_space<vmem>>, %arg5: memref<128x128xbf16, #tpu.memory_space<vmem>>, %arg6: memref<1x128xf32, #tpu.memory_space<vmem>>, %arg7: memref<8x128xf32, #tpu.memory_space<vmem>>, %arg8: memref<64x512xf32, #tpu.memory_space<vmem>>) attributes {dimension_semantics = [#tpu.dimension_semantics<arbitrary>], iteration_bounds = array<i64: 1>, scalar_prefetch = 0 : i64, scratch_operands = 1 : i64, tpu.core_type = #tpu.core_type<tc>, window_params = [{pipeline_mode = #tpu.pipeline_mode<synchronous>, transform_indices = @transform_0, window_bounds = array<i64: 64, 16>}, {pipeline_mode = #tpu.pipeline_mode<synchronous>, transform_indices = @transform_1, window_bounds = array<i64: 16, 512>}, {pipeline_mode = #tpu.pipeline_mode<synchronous>, transform_indices = @transform_2, window_bounds = array<i64: 128, 512>}, {pipeline_mode = #tpu.pipeline_mode<synchronous>, transform_indices = @transform_3, window_bounds = array<i64: 1, 512>}, {pipeline_mode = #tpu.pipeline_mode<synchronous>, transform_indices = @transform_4, window_bounds = array<i64: 128, 128>}, {pipeline_mode = #tpu.pipeline_mode<synchronous>, transform_indices = @transform_5, window_bounds = array<i64: 1, 128>}, {pipeline_mode = #tpu.pipeline_mode<synchronous>, transform_indices = @transform_6, window_bounds = array<i64: 8, 128>}]} {
    %c0 = arith.constant 0 : index
    %c0_0 = arith.constant 0 : index
    %0 = vector.load %arg1[%c0, %c0_0] : memref<64x16xbf16, #tpu.memory_space<vmem>>, vector<64x16xbf16>
    %c0_1 = arith.constant 0 : index
    %c0_2 = arith.constant 0 : index
    %1 = vector.load %arg2[%c0_1, %c0_2] : memref<16x512xbf16, #tpu.memory_space<vmem>>, vector<16x512xbf16>
    %cst = arith.constant dense<0.000000e+00> : vector<64x512xf32>
    %2 = tpu.matmul %0, %1, %cst {dimension_numbers = #tpu.dot_dimension_numbers<[1], [0], [0], [1], [0, 0, 1, 1], [], []>} : vector<64x16xbf16>, vector<16x512xbf16>, vector<64x512xf32> -> vector<64x512xf32>
    %c0_3 = arith.constant 0 : index
    %c0_4 = arith.constant 0 : index
    %3 = vector.load %arg4[%c0_3, %c0_4] : memref<1x512xf32, #tpu.memory_space<vmem>>, vector<1x512xf32>
    %4 = vector.broadcast %3 : vector<1x512xf32> to vector<64x512xf32>
    %5 = arith.addf %2, %4 : vector<64x512xf32>
    %c0_5 = arith.constant 0 : index
    %c0_6 = arith.constant 0 : index
    %6 = vector.load %arg8[%c0_5, %c0_6] : memref<64x512xf32, #tpu.memory_space<vmem>>, vector<64x512xf32>
    tpu.vector_store %arg8[%c0_5, %c0_6], %5 {strides = array<i32>} : memref<64x512xf32, #tpu.memory_space<vmem>>, vector<64x512xf32>,
    %cst_7 = arith.constant 0.000000e+00 : f32
    %7 = vector.broadcast %cst_7 : f32 to vector<8x128xf32>
    %cst_8 = arith.constant 0.000000e+00 : f32
    %8 = vector.broadcast %cst_8 : f32 to vector<8x128xf32>
    %c0_i32 = arith.constant 0 : i32
    %c8_i32 = arith.constant 8 : i32
    %9 = arith.muli %c0_i32, %c8_i32 : i32
    %10 = tpu.assume_multiple %9, 8 : i32
    %11 = arith.index_cast %10 : i32 to index
    %c0_9 = arith.constant 0 : index
    %12 = vector.load %arg8[%11, %c0_9] : memref<64x512xf32, #tpu.memory_space<vmem>>, vector<8x512xf32>
    %13 = arith.truncf %7 : vector<8x128xf32> to vector<8x128xbf16>
    %c0_10 = arith.constant 0 : index
    %c0_11 = arith.constant 0 : index
    %14 = vector.load %arg3[%c0_10, %c0_11] : memref<128x512xbf16, #tpu.memory_space<vmem>>, vector<128x512xbf16>
    %cst_12 = arith.constant dense<0.000000e+00> : vector<8x512xf32>
    %15 = tpu.matmul %13, %14, %cst_12 {dimension_numbers = #tpu.dot_dimension_numbers<[1], [0], [0], [1], [0, 0, 1, 1], [], []>} : vector<8x128xbf16>, vector<128x512xbf16>, vector<8x512xf32> -> vector<8x512xf32>
    %16 = arith.addf %12, %15 : vector<8x512xf32>
    %17 = vector.extract_strided_slice %16 {offsets = [0, 0], sizes = [8, 384], strides = [1, 1]} : vector<8x512xf32> to vector<8x384xf32>
    %18 = arith.negf %17 : vector<8x384xf32>
    %19 = math.exp %18 : vector<8x384xf32>
    %cst_13 = arith.constant 1.000000e+00 : f32
    %20 = vector.broadcast %cst_13 : f32 to vector<8x384xf32>
    %21 = arith.addf %20, %19 : vector<8x384xf32>
    %22 = arith.divf %20, %21 : vector<8x384xf32>
    %23 = vector.extract_strided_slice %22 {offsets = [0, 0], sizes = [8, 128], strides = [1, 1]} : vector<8x384xf32> to vector<8x128xf32>
    %24 = vector.extract_strided_slice %22 {offsets = [0, 128], sizes = [8, 128], strides = [1, 1]} : vector<8x384xf32> to vector<8x128xf32>
    %25 = vector.extract_strided_slice %22 {offsets = [0, 256], sizes = [8, 128], strides = [1, 1]} : vector<8x384xf32> to vector<8x128xf32>
    %26 = vector.extract_strided_slice %16 {offsets = [0, 384], sizes = [8, 128], strides = [1, 1]} : vector<8x512xf32> to vector<8x128xf32>
    %27 = math.tanh %26 : vector<8x128xf32>
    %28 = arith.mulf %24, %8 : vector<8x128xf32>
    %29 = arith.mulf %23, %27 : vector<8x128xf32>
    %30 = arith.addf %28, %29 : vector<8x128xf32>
    %31 = math.tanh %30 : vector<8x128xf32>
    %32 = arith.mulf %25, %31 : vector<8x128xf32>
    %c1_i32 = arith.constant 1 : i32
    %c8_i32_14 = arith.constant 8 : i32
    %33 = arith.muli %c1_i32, %c8_i32_14 : i32
    %34 = tpu.assume_multiple %33, 8 : i32
    %35 = arith.index_cast %34 : i32 to index
    %c0_15 = arith.constant 0 : index
    %36 = vector.load %arg8[%35, %c0_15] : memref<64x512xf32, #tpu.memory_space<vmem>>, vector<8x512xf32>
    %37 = arith.truncf %32 : vector<8x128xf32> to vector<8x128xbf16>
    %c0_16 = arith.constant 0 : index
    %c0_17 = arith.constant 0 : index
    %38 = vector.load %arg3[%c0_16, %c0_17] : memref<128x512xbf16, #tpu.memory_space<vmem>>, vector<128x512xbf16>
    %cst_18 = arith.constant dense<0.000000e+00> : vector<8x512xf32>
    %39 = tpu.matmul %37, %38, %cst_18 {dimension_numbers = #tpu.dot_dimension_numbers<[1], [0], [0], [1], [0, 0, 1, 1], [], []>} : vector<8x128xbf16>, vector<128x512xbf16>, vector<8x512xf32> -> vector<8x512xf32>
    %40 = arith.addf %36, %39 : vector<8x512xf32>
    %41 = vector.extract_strided_slice %40 {offsets = [0, 0], sizes = [8, 384], strides = [1, 1]} : vector<8x512xf32> to vector<8x384xf32>
    %42 = arith.negf %41 : vector<8x384xf32>
    %43 = math.exp %42 : vector<8x384xf32>
    %cst_19 = arith.constant 1.000000e+00 : f32
    %44 = vector.broadcast %cst_19 : f32 to vector<8x384xf32>
    %45 = arith.addf %44, %43 : vector<8x384xf32>
    %46 = arith.divf %44, %45 : vector<8x384xf32>
    %47 = vector.extract_strided_slice %46 {offsets = [0, 0], sizes = [8, 128], strides = [1, 1]} : vector<8x384xf32> to vector<8x128xf32>
    %48 = vector.extract_strided_slice %46 {offsets = [0, 128], sizes = [8, 128], strides = [1, 1]} : vector<8x384xf32> to vector<8x128xf32>
    %49 = vector.extract_strided_slice %46 {offsets = [0, 256], sizes = [8, 128], strides = [1, 1]} : vector<8x384xf32> to vector<8x128xf32>
    %50 = vector.extract_strided_slice %40 {offsets = [0, 384], sizes = [8, 128], strides = [1, 1]} : vector<8x512xf32> to vector<8x128xf32>
    %51 = math.tanh %50 : vector<8x128xf32>
    %52 = arith.mulf %48, %30 : vector<8x128xf32>
    %53 = arith.mulf %47, %51 : vector<8x128xf32>
    %54 = arith.addf %52, %53 : vector<8x128xf32>
    %55 = math.tanh %54 : vector<8x128xf32>
    %56 = arith.mulf %49, %55 : vector<8x128xf32>
    %c2_i32 = arith.constant 2 : i32
    %c8_i32_20 = arith.constant 8 : i32
    %57 = arith.muli %c2_i32, %c8_i32_20 : i32
    %58 = tpu.assume_multiple %57, 8 : i32
    %59 = arith.index_cast %58 : i32 to index
    %c0_21 = arith.constant 0 : index
    %60 = vector.load %arg8[%59, %c0_21] : memref<64x512xf32, #tpu.memory_space<vmem>>, vector<8x512xf32>
    %61 = arith.truncf %56 : vector<8x128xf32> to vector<8x128xbf16>
    %c0_22 = arith.constant 0 : index
    %c0_23 = arith.constant 0 : index
    %62 = vector.load %arg3[%c0_22, %c0_23] : memref<128x512xbf16, #tpu.memory_space<vmem>>, vector<128x512xbf16>
    %cst_24 = arith.constant dense<0.000000e+00> : vector<8x512xf32>
    %63 = tpu.matmul %61, %62, %cst_24 {dimension_numbers = #tpu.dot_dimension_numbers<[1], [0], [0], [1], [0, 0, 1, 1], [], []>} : vector<8x128xbf16>, vector<128x512xbf16>, vector<8x512xf32> -> vector<8x512xf32>
    %64 = arith.addf %60, %63 : vector<8x512xf32>
    %65 = vector.extract_strided_slice %64 {offsets = [0, 0], sizes = [8, 384], strides = [1, 1]} : vector<8x512xf32> to vector<8x384xf32>
    %66 = arith.negf %65 : vector<8x384xf32>
    %67 = math.exp %66 : vector<8x384xf32>
    %cst_25 = arith.constant 1.000000e+00 : f32
    %68 = vector.broadcast %cst_25 : f32 to vector<8x384xf32>
    %69 = arith.addf %68, %67 : vector<8x384xf32>
    %70 = arith.divf %68, %69 : vector<8x384xf32>
    %71 = vector.extract_strided_slice %70 {offsets = [0, 0], sizes = [8, 128], strides = [1, 1]} : vector<8x384xf32> to vector<8x128xf32>
    %72 = vector.extract_strided_slice %70 {offsets = [0, 128], sizes = [8, 128], strides = [1, 1]} : vector<8x384xf32> to vector<8x128xf32>
    %73 = vector.extract_strided_slice %70 {offsets = [0, 256], sizes = [8, 128], strides = [1, 1]} : vector<8x384xf32> to vector<8x128xf32>
    %74 = vector.extract_strided_slice %64 {offsets = [0, 384], sizes = [8, 128], strides = [1, 1]} : vector<8x512xf32> to vector<8x128xf32>
    %75 = math.tanh %74 : vector<8x128xf32>
    %76 = arith.mulf %72, %54 : vector<8x128xf32>
    %77 = arith.mulf %71, %75 : vector<8x128xf32>
    %78 = arith.addf %76, %77 : vector<8x128xf32>
    %79 = math.tanh %78 : vector<8x128xf32>
    %80 = arith.mulf %73, %79 : vector<8x128xf32>
    %c3_i32 = arith.constant 3 : i32
    %c8_i32_26 = arith.constant 8 : i32
    %81 = arith.muli %c3_i32, %c8_i32_26 : i32
    %82 = tpu.assume_multiple %81, 8 : i32
    %83 = arith.index_cast %82 : i32 to index
    %c0_27 = arith.constant 0 : index
    %84 = vector.load %arg8[%83, %c0_27] : memref<64x512xf32, #tpu.memory_space<vmem>>, vector<8x512xf32>
    %85 = arith.truncf %80 : vector<8x128xf32> to vector<8x128xbf16>
    %c0_28 = arith.constant 0 : index
    %c0_29 = arith.constant 0 : index
    %86 = vector.load %arg3[%c0_28, %c0_29] : memref<128x512xbf16, #tpu.memory_space<vmem>>, vector<128x512xbf16>
    %cst_30 = arith.constant dense<0.000000e+00> : vector<8x512xf32>
    %87 = tpu.matmul %85, %86, %cst_30 {dimension_numbers = #tpu.dot_dimension_numbers<[1], [0], [0], [1], [0, 0, 1, 1], [], []>} : vector<8x128xbf16>, vector<128x512xbf16>, vector<8x512xf32> -> vector<8x512xf32>
    %88 = arith.addf %84, %87 : vector<8x512xf32>
    %89 = vector.extract_strided_slice %88 {offsets = [0, 0], sizes = [8, 384], strides = [1, 1]} : vector<8x512xf32> to vector<8x384xf32>
    %90 = arith.negf %89 : vector<8x384xf32>
    %91 = math.exp %90 : vector<8x384xf32>
    %cst_31 = arith.constant 1.000000e+00 : f32
    %92 = vector.broadcast %cst_31 : f32 to vector<8x384xf32>
    %93 = arith.addf %92, %91 : vector<8x384xf32>
    %94 = arith.divf %92, %93 : vector<8x384xf32>
    %95 = vector.extract_strided_slice %94 {offsets = [0, 0], sizes = [8, 128], strides = [1, 1]} : vector<8x384xf32> to vector<8x128xf32>
    %96 = vector.extract_strided_slice %94 {offsets = [0, 128], sizes = [8, 128], strides = [1, 1]} : vector<8x384xf32> to vector<8x128xf32>
    %97 = vector.extract_strided_slice %94 {offsets = [0, 256], sizes = [8, 128], strides = [1, 1]} : vector<8x384xf32> to vector<8x128xf32>
    %98 = vector.extract_strided_slice %88 {offsets = [0, 384], sizes = [8, 128], strides = [1, 1]} : vector<8x512xf32> to vector<8x128xf32>
    %99 = math.tanh %98 : vector<8x128xf32>
    %100 = arith.mulf %96, %78 : vector<8x128xf32>
    %101 = arith.mulf %95, %99 : vector<8x128xf32>
    %102 = arith.addf %100, %101 : vector<8x128xf32>
    %103 = math.tanh %102 : vector<8x128xf32>
    %104 = arith.mulf %97, %103 : vector<8x128xf32>
    %c4_i32 = arith.constant 4 : i32
    %c8_i32_32 = arith.constant 8 : i32
    %105 = arith.muli %c4_i32, %c8_i32_32 : i32
    %106 = tpu.assume_multiple %105, 8 : i32
    %107 = arith.index_cast %106 : i32 to index
    %c0_33 = arith.constant 0 : index
    %108 = vector.load %arg8[%107, %c0_33] : memref<64x512xf32, #tpu.memory_space<vmem>>, vector<8x512xf32>
    %109 = arith.truncf %104 : vector<8x128xf32> to vector<8x128xbf16>
    %c0_34 = arith.constant 0 : index
    %c0_35 = arith.constant 0 : index
    %110 = vector.load %arg3[%c0_34, %c0_35] : memref<128x512xbf16, #tpu.memory_space<vmem>>, vector<128x512xbf16>
    %cst_36 = arith.constant dense<0.000000e+00> : vector<8x512xf32>
    %111 = tpu.matmul %109, %110, %cst_36 {dimension_numbers = #tpu.dot_dimension_numbers<[1], [0], [0], [1], [0, 0, 1, 1], [], []>} : vector<8x128xbf16>, vector<128x512xbf16>, vector<8x512xf32> -> vector<8x512xf32>
    %112 = arith.addf %108, %111 : vector<8x512xf32>
    %113 = vector.extract_strided_slice %112 {offsets = [0, 0], sizes = [8, 384], strides = [1, 1]} : vector<8x512xf32> to vector<8x384xf32>
    %114 = arith.negf %113 : vector<8x384xf32>
    %115 = math.exp %114 : vector<8x384xf32>
    %cst_37 = arith.constant 1.000000e+00 : f32
    %116 = vector.broadcast %cst_37 : f32 to vector<8x384xf32>
    %117 = arith.addf %116, %115 : vector<8x384xf32>
    %118 = arith.divf %116, %117 : vector<8x384xf32>
    %119 = vector.extract_strided_slice %118 {offsets = [0, 0], sizes = [8, 128], strides = [1, 1]} : vector<8x384xf32> to vector<8x128xf32>
    %120 = vector.extract_strided_slice %118 {offsets = [0, 128], sizes = [8, 128], strides = [1, 1]} : vector<8x384xf32> to vector<8x128xf32>
    %121 = vector.extract_strided_slice %118 {offsets = [0, 256], sizes = [8, 128], strides = [1, 1]} : vector<8x384xf32> to vector<8x128xf32>
    %122 = vector.extract_strided_slice %112 {offsets = [0, 384], sizes = [8, 128], strides = [1, 1]} : vector<8x512xf32> to vector<8x128xf32>
    %123 = math.tanh %122 : vector<8x128xf32>
    %124 = arith.mulf %120, %102 : vector<8x128xf32>
    %125 = arith.mulf %119, %123 : vector<8x128xf32>
    %126 = arith.addf %124, %125 : vector<8x128xf32>
    %127 = math.tanh %126 : vector<8x128xf32>
    %128 = arith.mulf %121, %127 : vector<8x128xf32>
    %c5_i32 = arith.constant 5 : i32
    %c8_i32_38 = arith.constant 8 : i32
    %129 = arith.muli %c5_i32, %c8_i32_38 : i32
    %130 = tpu.assume_multiple %129, 8 : i32
    %131 = arith.index_cast %130 : i32 to index
    %c0_39 = arith.constant 0 : index
    %132 = vector.load %arg8[%131, %c0_39] : memref<64x512xf32, #tpu.memory_space<vmem>>, vector<8x512xf32>
    %133 = arith.truncf %128 : vector<8x128xf32> to vector<8x128xbf16>
    %c0_40 = arith.constant 0 : index
    %c0_41 = arith.constant 0 : index
    %134 = vector.load %arg3[%c0_40, %c0_41] : memref<128x512xbf16, #tpu.memory_space<vmem>>, vector<128x512xbf16>
    %cst_42 = arith.constant dense<0.000000e+00> : vector<8x512xf32>
    %135 = tpu.matmul %133, %134, %cst_42 {dimension_numbers = #tpu.dot_dimension_numbers<[1], [0], [0], [1], [0, 0, 1, 1], [], []>} : vector<8x128xbf16>, vector<128x512xbf16>, vector<8x512xf32> -> vector<8x512xf32>
    %136 = arith.addf %132, %135 : vector<8x512xf32>
    %137 = vector.extract_strided_slice %136 {offsets = [0, 0], sizes = [8, 384], strides = [1, 1]} : vector<8x512xf32> to vector<8x384xf32>
    %138 = arith.negf %137 : vector<8x384xf32>
    %139 = math.exp %138 : vector<8x384xf32>
    %cst_43 = arith.constant 1.000000e+00 : f32
    %140 = vector.broadcast %cst_43 : f32 to vector<8x384xf32>
    %141 = arith.addf %140, %139 : vector<8x384xf32>
    %142 = arith.divf %140, %141 : vector<8x384xf32>
    %143 = vector.extract_strided_slice %142 {offsets = [0, 0], sizes = [8, 128], strides = [1, 1]} : vector<8x384xf32> to vector<8x128xf32>
    %144 = vector.extract_strided_slice %142 {offsets = [0, 128], sizes = [8, 128], strides = [1, 1]} : vector<8x384xf32> to vector<8x128xf32>
    %145 = vector.extract_strided_slice %142 {offsets = [0, 256], sizes = [8, 128], strides = [1, 1]} : vector<8x384xf32> to vector<8x128xf32>
    %146 = vector.extract_strided_slice %136 {offsets = [0, 384], sizes = [8, 128], strides = [1, 1]} : vector<8x512xf32> to vector<8x128xf32>
    %147 = math.tanh %146 : vector<8x128xf32>
    %148 = arith.mulf %144, %126 : vector<8x128xf32>
    %149 = arith.mulf %143, %147 : vector<8x128xf32>
    %150 = arith.addf %148, %149 : vector<8x128xf32>
    %151 = math.tanh %150 : vector<8x128xf32>
    %152 = arith.mulf %145, %151 : vector<8x128xf32>
    %c6_i32 = arith.constant 6 : i32
    %c8_i32_44 = arith.constant 8 : i32
    %153 = arith.muli %c6_i32, %c8_i32_44 : i32
    %154 = tpu.assume_multiple %153, 8 : i32
    %155 = arith.index_cast %154 : i32 to index
    %c0_45 = arith.constant 0 : index
    %156 = vector.load %arg8[%155, %c0_45] : memref<64x512xf32, #tpu.memory_space<vmem>>, vector<8x512xf32>
    %157 = arith.truncf %152 : vector<8x128xf32> to vector<8x128xbf16>
    %c0_46 = arith.constant 0 : index
    %c0_47 = arith.constant 0 : index
    %158 = vector.load %arg3[%c0_46, %c0_47] : memref<128x512xbf16, #tpu.memory_space<vmem>>, vector<128x512xbf16>
    %cst_48 = arith.constant dense<0.000000e+00> : vector<8x512xf32>
    %159 = tpu.matmul %157, %158, %cst_48 {dimension_numbers = #tpu.dot_dimension_numbers<[1], [0], [0], [1], [0, 0, 1, 1], [], []>} : vector<8x128xbf16>, vector<128x512xbf16>, vector<8x512xf32> -> vector<8x512xf32>
    %160 = arith.addf %156, %159 : vector<8x512xf32>
    %161 = vector.extract_strided_slice %160 {offsets = [0, 0], sizes = [8, 384], strides = [1, 1]} : vector<8x512xf32> to vector<8x384xf32>
    %162 = arith.negf %161 : vector<8x384xf32>
    %163 = math.exp %162 : vector<8x384xf32>
    %cst_49 = arith.constant 1.000000e+00 : f32
    %164 = vector.broadcast %cst_49 : f32 to vector<8x384xf32>
    %165 = arith.addf %164, %163 : vector<8x384xf32>
    %166 = arith.divf %164, %165 : vector<8x384xf32>
    %167 = vector.extract_strided_slice %166 {offsets = [0, 0], sizes = [8, 128], strides = [1, 1]} : vector<8x384xf32> to vector<8x128xf32>
    %168 = vector.extract_strided_slice %166 {offsets = [0, 128], sizes = [8, 128], strides = [1, 1]} : vector<8x384xf32> to vector<8x128xf32>
    %169 = vector.extract_strided_slice %166 {offsets = [0, 256], sizes = [8, 128], strides = [1, 1]} : vector<8x384xf32> to vector<8x128xf32>
    %170 = vector.extract_strided_slice %160 {offsets = [0, 384], sizes = [8, 128], strides = [1, 1]} : vector<8x512xf32> to vector<8x128xf32>
    %171 = math.tanh %170 : vector<8x128xf32>
    %172 = arith.mulf %168, %150 : vector<8x128xf32>
    %173 = arith.mulf %167, %171 : vector<8x128xf32>
    %174 = arith.addf %172, %173 : vector<8x128xf32>
    %175 = math.tanh %174 : vector<8x128xf32>
    %176 = arith.mulf %169, %175 : vector<8x128xf32>
    %c7_i32 = arith.constant 7 : i32
    %c8_i32_50 = arith.constant 8 : i32
    %177 = arith.muli %c7_i32, %c8_i32_50 : i32
    %178 = tpu.assume_multiple %177, 8 : i32
    %179 = arith.index_cast %178 : i32 to index
    %c0_51 = arith.constant 0 : index
    %180 = vector.load %arg8[%179, %c0_51] : memref<64x512xf32, #tpu.memory_space<vmem>>, vector<8x512xf32>
    %181 = arith.truncf %176 : vector<8x128xf32> to vector<8x128xbf16>
    %c0_52 = arith.constant 0 : index
    %c0_53 = arith.constant 0 : index
    %182 = vector.load %arg3[%c0_52, %c0_53] : memref<128x512xbf16, #tpu.memory_space<vmem>>, vector<128x512xbf16>
    %cst_54 = arith.constant dense<0.000000e+00> : vector<8x512xf32>
    %183 = tpu.matmul %181, %182, %cst_54 {dimension_numbers = #tpu.dot_dimension_numbers<[1], [0], [0], [1], [0, 0, 1, 1], [], []>} : vector<8x128xbf16>, vector<128x512xbf16>, vector<8x512xf32> -> vector<8x512xf32>
    %184 = arith.addf %180, %183 : vector<8x512xf32>
    %185 = vector.extract_strided_slice %184 {offsets = [0, 0], sizes = [8, 384], strides = [1, 1]} : vector<8x512xf32> to vector<8x384xf32>
    %186 = arith.negf %185 : vector<8x384xf32>
    %187 = math.exp %186 : vector<8x384xf32>
    %cst_55 = arith.constant 1.000000e+00 : f32
    %188 = vector.broadcast %cst_55 : f32 to vector<8x384xf32>
    %189 = arith.addf %188, %187 : vector<8x384xf32>
    %190 = arith.divf %188, %189 : vector<8x384xf32>
    %191 = vector.extract_strided_slice %190 {offsets = [0, 0], sizes = [8, 128], strides = [1, 1]} : vector<8x384xf32> to vector<8x128xf32>
    %192 = vector.extract_strided_slice %190 {offsets = [0, 128], sizes = [8, 128], strides = [1, 1]} : vector<8x384xf32> to vector<8x128xf32>
    %193 = vector.extract_strided_slice %190 {offsets = [0, 256], sizes = [8, 128], strides = [1, 1]} : vector<8x384xf32> to vector<8x128xf32>
    %194 = vector.extract_strided_slice %184 {offsets = [0, 384], sizes = [8, 128], strides = [1, 1]} : vector<8x512xf32> to vector<8x128xf32>
    %195 = math.tanh %194 : vector<8x128xf32>
    %196 = arith.mulf %192, %174 : vector<8x128xf32>
    %197 = arith.mulf %191, %195 : vector<8x128xf32>
    %198 = arith.addf %196, %197 : vector<8x128xf32>
    %199 = math.tanh %198 : vector<8x128xf32>
    %200 = arith.mulf %193, %199 : vector<8x128xf32>
    %c8_i32_56 = arith.constant 8 : i32
    %201 = arith.truncf %200 : vector<8x128xf32> to vector<8x128xbf16>
    %c0_57 = arith.constant 0 : index
    %c0_58 = arith.constant 0 : index
    %202 = vector.load %arg5[%c0_57, %c0_58] : memref<128x128xbf16, #tpu.memory_space<vmem>>, vector<128x128xbf16>
    %cst_59 = arith.constant dense<0.000000e+00> : vector<8x128xf32>
    %203 = tpu.matmul %201, %202, %cst_59 {dimension_numbers = #tpu.dot_dimension_numbers<[1], [0], [0], [1], [0, 0, 1, 1], [], []>} : vector<8x128xbf16>, vector<128x128xbf16>, vector<8x128xf32> -> vector<8x128xf32>
    %c0_60 = arith.constant 0 : index
    %c0_61 = arith.constant 0 : index
    %204 = vector.load %arg6[%c0_60, %c0_61] : memref<1x128xf32, #tpu.memory_space<vmem>>, vector<1x128xf32>
    %205 = vector.broadcast %204 : vector<1x128xf32> to vector<8x128xf32>
    %206 = arith.addf %203, %205 : vector<8x128xf32>
    %c0_62 = arith.constant 0 : index
    %c0_63 = arith.constant 0 : index
    %207 = vector.load %arg7[%c0_62, %c0_63] : memref<8x128xf32, #tpu.memory_space<vmem>>, vector<8x128xf32>
    tpu.vector_store %arg7[%c0_62, %c0_63], %206 {strides = array<i32>} : memref<8x128xf32, #tpu.memory_space<vmem>>, vector<8x128xf32>,
    return
  }
  func.func @transform_0(%arg0: i32) -> (i32, i32) {
    %c0_i32 = arith.constant 0 : i32
    %c0_i32_0 = arith.constant 0 : i32
    %c0_i32_1 = arith.constant 0 : i32
    return %c0_i32, %c0_i32_0 : i32, i32
  }
  func.func @transform_1(%arg0: i32) -> (i32, i32) {
    %c0_i32 = arith.constant 0 : i32
    %c0_i32_0 = arith.constant 0 : i32
    %c0_i32_1 = arith.constant 0 : i32
    return %c0_i32, %c0_i32_0 : i32, i32
  }
  func.func @transform_2(%arg0: i32) -> (i32, i32) {
    %c0_i32 = arith.constant 0 : i32
    %c0_i32_0 = arith.constant 0 : i32
    %c0_i32_1 = arith.constant 0 : i32
    return %c0_i32, %c0_i32_0 : i32, i32
  }
  func.func @transform_3(%arg0: i32) -> (i32, i32) {
    %c0_i32 = arith.constant 0 : i32
    %c0_i32_0 = arith.constant 0 : i32
    %c0_i32_1 = arith.constant 0 : i32
    return %c0_i32, %c0_i32_0 : i32, i32
  }
  func.func @transform_4(%arg0: i32) -> (i32, i32) {
    %c0_i32 = arith.constant 0 : i32
    %c0_i32_0 = arith.constant 0 : i32
    %c0_i32_1 = arith.constant 0 : i32
    return %c0_i32, %c0_i32_0 : i32, i32
  }
  func.func @transform_5(%arg0: i32) -> (i32, i32) {
    %c0_i32 = arith.constant 0 : i32
    %c0_i32_0 = arith.constant 0 : i32
    %c0_i32_1 = arith.constant 0 : i32
    return %c0_i32, %c0_i32_0 : i32, i32
  }
  func.func @transform_6(%arg0: i32) -> (i32, i32) {
    %c0_i32 = arith.constant 0 : i32
    %c0_i32_0 = arith.constant 0 : i32
    %c0_i32_1 = arith.constant 0 : i32
    return %c0_i32, %c0_i32_0 : i32, i32
  }
}

</mosaic_0001>

<bundles_post_ra>
// kernel: tpu_custom_call.1
= control target key start
LH: loop header
LB: loop body
LE: loop exit
PB: predicated region body
PF: predicated region fallthrough
CT: control target
= control target key end

     0   :  { %11 = vsyncpa [#allocation4], 0  ;;  %s2668_s0 = inlined_call_operand.vmem [shape: bf16[64,16], index: 0, kind: input, shape index: {}]   ;;  %s2669_s1 = inlined_call_operand.vmem [shape: bf16[16,512], index: 1, kind: input, shape index: {}]   ;;  %s2670_s2 = inlined_call_operand.hbm [shape: bf16[128,512], index: 2, kind: input, shape index: {}]   ;;  %s2671_s3 = inlined_call_operand.vmem [shape: f32[1,512], index: 3, kind: input, shape index: {}]   ;;  %s2672_s4 = inlined_call_operand.hbm [shape: bf16[128,128], index: 4, kind: input, shape index: {}]   ;;  %s2673_s5 = inlined_call_operand.vmem [shape: f32[1,128], index: 5, kind: input, shape index: {}]   ;;  %s2674_s6 = inlined_call_operand.hbm [shape: f32[8,128], index: 6, kind: output, shape index: {}]  }
   0x1   :  { %12 = vsyncpa [#allocation7], 0 }
   0x2   :  { %13 = vsyncpa [#allocation5], 0  ;;  %s2007_s21 = smov [#allocation3]   ;;  %s1935_s25 = scalar_lea.hbm %s2670_s2, 4096 }
   0x3   :  { %s23_s22 = sshll.u32 %s2007_s21, 4  ;;  %p1936_p0 = scmp.ne.s32.totalorder %s2670_s2, %s1935_s25  ;;  %s24_s22 = int_to_ptr.vmem [resolvable:$true] %s23_s22 }
   0x4   :  { %p1939_p1 = scmp.lt.u32.totalorder %s1935_s25, %s2670_s2 }
   0x6   :  { %p1941_p2 = pnand %p1939_p1, %p1936_p0 }
   0x8   :  { %1944 = shalt.err (!%p1941_p2)
}
   0x9   :  { %s1945_s30 = scalar_lea.vmem %s24_s22, 4096  ;;  %p1950_p4 = scmp.lt.s32.totalorder %s24_s22, %s24_s22 }
   0xa   :  { %p1946_p3 = scmp.ne.s32.totalorder %s24_s22, %s1945_s30  ;;  %p1951_p5 = scmp.lt.s32.totalorder %s1945_s30, %s1945_s30 }
   0xc   :  { %p1952_p6 = por %p1951_p5, %p1950_p4 }
   0xe   :  { %p1953_p7 = pnand %p1952_p6, %p1946_p3 }
  0x10   :  { %1956 = shalt.err (!%p1953_p7)
}
  0x11   :  { %s2008_s7 = smov 256   ;;  %s2009_s8 = smov 16  }
  0x12   :  { %29 = dma.hbm_to_vmem [thread:$0]  %s2670_s2, 4096, %s24_s22, [#allocation4], %s2008_s7, %s2008_s7, %s2009_s8  }
  0x13   :  { %s2010_s11 = smov [#allocation6]   ;;  %s1957_s15 = scalar_lea.hbm %s2672_s4, 1024 }
  0x14   :  { %s37_s12 = sshll.u32 %s2010_s11, 4  ;;  %p1958_p8 = scmp.ne.s32.totalorder %s2672_s4, %s1957_s15  ;;  %s38_s12 = int_to_ptr.vmem [resolvable:$true] %s37_s12 }
  0x15   :  { %p1961_p9 = scmp.lt.u32.totalorder %s1957_s15, %s2672_s4 }
  0x17   :  { %p1963_p10 = pnand %p1961_p9, %p1958_p8 }
  0x19   :  { %1966 = shalt.err (!%p1963_p10)
}
  0x1a   :  { %s1967_s20 = scalar_lea.vmem %s38_s12, 1024  ;;  %p1972_p12 = scmp.lt.s32.totalorder %s38_s12, %s38_s12 }
  0x1b   :  { %p1968_p11 = scmp.ne.s32.totalorder %s38_s12, %s1967_s20  ;;  %p1973_p13 = scmp.lt.s32.totalorder %s1967_s20, %s1967_s20 }
  0x1d   :  { %p1974_p0 = por %p1973_p13, %p1972_p12 }
  0x1f   :  { %p1975_p1 = pnand %p1974_p0, %p1968_p11 }
  0x21   :  { %1978 = shalt.err (!%p1975_p1)
}
  0x22   :  { %s2011_s2 = smov 64   ;;  %s2012_s21 = smov 4  }
  0x23   :  { %43 = dma.hbm_to_vmem [thread:$0]  %s2672_s4, 1024, %s38_s12, [#allocation7], %s2011_s2, %s2011_s2, %s2012_s21  }
  0x24   :  { %2001 = dma.done.wait [#allocation4], 4096  }
  0x25   :  { %2002 = vsyncadd [#allocation4], 4294963200 }
  0x26   :  { %2003 = dma.done.wait [#allocation7], 1024  }
  0x27   :  { %2004 = vsyncadd [#allocation7], 4294966272  ;;  %v2675_v0 = vmov 0   ;;  %v1709_v1 = vld [vmem:[%s2669_s1 + $0x4] ss:$16 sps:$4 sm:$0xff]   ;;  %vm127_vm0 = vcmask 130048   ;;  %v67_v41 = vlaneseq }
  0x28   :  { %172 = vmatprep.mubr.bf16.mxu0 %v2675_v0  ;;  %245 = vmatprep.mubr.bf16.mxu1 %v2675_v0  ;;  %v1711_v2 = vld [vmem:[%s2669_s1 + $0xc] ss:$16 sps:$4 sm:$0xff]   ;;  %v1713_v3 = vld [vmem:[%s2669_s1] ss:$16 sps:$4 sm:$0xff]   ;;  %v1714_v4 = vld [vmem:[%s2669_s1 + $0x8] ss:$16 sps:$4 sm:$0xff]  }
  0x29   :  { %140 = vmatprep.subr.bf16.mxu0 %v1709_v1  ;;  %213 = vmatprep.subr.bf16.mxu1 %v1711_v2  ;;  %v1715_v5 = vld [vmem:[%s2668_s0] sm:$0xff]   ;;  %v2095_v7 = vld [vmem:[#allocation3 + $0xc] ss:$16 sps:$4 sm:$0xff]   ;;  %v2100_v9 = vld [vmem:[#allocation3 + $0x8] ss:$16 sps:$4 sm:$0xff]   ;;  %v68_v42 = vshrl.u32 %v67_v41, 7 }
  0x2a   :  { %141 = vmatpush1.bf16.msra.mxu0 %v1713_v3  ;;  %214 = vmatpush1.bf16.msra.mxu1 %v1714_v4  ;;  %v2093_v6 = vld [vmem:[#allocation3 + $0x4] ss:$16 sps:$4 sm:$0xff]   ;;  %v2097_v8 = vld [vmem:[#allocation3] ss:$16 sps:$4 sm:$0xff]   ;;  %v2108_v11 = vld [vmem:[#allocation3 + $0x2c] ss:$16 sps:$4 sm:$0xff]  }
  0x2b   :  { %517 = vmatprep.subr.bf16.mxu0 %v2093_v6  ;;  %v2104_v10 = vld [vmem:[#allocation3 + $0x24] ss:$16 sps:$4 sm:$0xff]   ;;  %558 = vmatprep.subr.bf16.mxu1 %v2095_v7  ;;  %v2110_v12 = vld [vmem:[#allocation3 + $0x20] ss:$16 sps:$4 sm:$0xff]   ;;  %v2112_v13 = vld [vmem:[#allocation3 + $0x28] ss:$16 sps:$4 sm:$0xff]  }
  0x2c   :  { %v1728_v14 = vld [vmem:[%s2668_s0 + $0x8] sm:$0xff]   ;;  %v2121_v15 = vld [vmem:[#allocation3 + $0x44] ss:$16 sps:$4 sm:$0xff]   ;;  %v2127_v17 = vld [vmem:[#allocation3 + $0x40] ss:$16 sps:$4 sm:$0xff]   ;;  %v77_v43 = vsub.s32 2, %v68_v42 }
  0x2d   :  { %1597 = vmatmul.mubr.msk.bf16.vlgmr.msra.gmra.mrb[0].mxu0 %vm127_vm0, %v1715_v5  ;;  %1601 = vmatmul.mubr.msk.bf16.vlgmr.msra.gmra.mrb[0].mxu1 %vm127_vm0, %v1715_v5  ;;  %v2124_v16 = vld [vmem:[#allocation3 + $0x4c] ss:$16 sps:$4 sm:$0xff]   ;;  %v2129_v18 = vld [vmem:[#allocation3 + $0x48] ss:$16 sps:$4 sm:$0xff]   ;;  %v2133_v19 = vld [vmem:[#allocation3 + $0x64] ss:$16 sps:$4 sm:$0xff]  }
  0x2e   :  { %518 = vmatpush1.bf16.msra.mxu0 %v2097_v8  ;;  %559 = vmatpush1.bf16.msra.mxu1 %v2100_v9  ;;  %v2136_v20 = vld [vmem:[#allocation3 + $0x6c] ss:$16 sps:$4 sm:$0xff]   ;;  %v2140_v21 = vld [vmem:[#allocation3 + $0x60] ss:$16 sps:$4 sm:$0xff]   ;;  %v2143_v22 = vld [vmem:[#allocation3 + $0x68] ss:$16 sps:$4 sm:$0xff]  }
  0x2f   :  { %519 = vmatprep.subr.bf16.mxu0 %v2104_v10  ;;  %560 = vmatprep.subr.bf16.mxu1 %v2108_v11  ;;  %v2148_v23 = vld [vmem:[#allocation3 + $0x84] ss:$16 sps:$4 sm:$0xff]   ;;  %v2152_v24 = vld [vmem:[#allocation3 + $0x8c] ss:$16 sps:$4 sm:$0xff]   ;;  %v2158_v26 = vld [vmem:[#allocation3 + $0x80] ss:$16 sps:$4 sm:$0xff]  }
  0x30   :  { %182 = vmatprep.mubr.bf16.mxu0 %v2675_v0  ;;  %255 = vmatprep.mubr.bf16.mxu1 %v2675_v0  ;;  %v1741_v25 = vld [vmem:[%s2668_s0 + $0x10] sm:$0xff]   ;;  %v2162_v27 = vld [vmem:[#allocation3 + $0x88] ss:$16 sps:$4 sm:$0xff]   ;;  %v2167_v29 = vld [vmem:[#allocation3 + $0xac] ss:$16 sps:$4 sm:$0xff]   ;;  %v81_v44 = vsub.s32 3, %v68_v42 }
  0x31   :  { %v2164_v28 = vld [vmem:[#allocation3 + $0xa4] ss:$16 sps:$4 sm:$0xff]   ;;  %v2172_v30 = vld [vmem:[#allocation3 + $0xa0] ss:$16 sps:$4 sm:$0xff]   ;;  %v2174_v31 = vld [vmem:[#allocation3 + $0xa8] ss:$16 sps:$4 sm:$0xff]  }
  0x32   :  { %520 = vmatpush1.bf16.msra.mxu0 %v2110_v12  ;;  %561 = vmatpush1.bf16.msra.mxu1 %v2112_v13  ;;  %v1754_v32 = vld [vmem:[%s2668_s0 + $0x18] sm:$0xff]   ;;  %v2182_v33 = vld [vmem:[#allocation3 + $0xc4] ss:$16 sps:$4 sm:$0xff]   ;;  %v2188_v35 = vld [vmem:[#allocation3 + $0xc0] ss:$16 sps:$4 sm:$0xff]   ;;  %v69_v45 = vsub.s32 0, %v68_v42 }
  0x33   :  { %521 = vmatprep.subr.bf16.mxu0 %v2121_v15  ;;  %562 = vmatprep.subr.bf16.mxu1 %v2124_v16  ;;  %v2186_v34 = vld [vmem:[#allocation3 + $0xcc] ss:$16 sps:$4 sm:$0xff]   ;;  %v2190_v36 = vld [vmem:[#allocation3 + $0xc8] ss:$16 sps:$4 sm:$0xff]   ;;  %v2192_v37 = vld [vmem:[#allocation3 + $0xe4] ss:$16 sps:$4 sm:$0xff]  }
  0x34   :  { %v2195_v38 = vld [vmem:[#allocation3 + $0xec] ss:$16 sps:$4 sm:$0xff]   ;;  %v2200_v39 = vld [vmem:[#allocation3 + $0xe0] ss:$16 sps:$4 sm:$0xff]   ;;  %v2208_v40 = vld [vmem:[#allocation3 + $0xe8] ss:$16 sps:$4 sm:$0xff]  }
  0x35   :  { %1598 = vmatmul.mubr.msk.bf16.gmra.mrb[4].mxu0 %vm127_vm0, %v1728_v14  ;;  %1602 = vmatmul.mubr.msk.bf16.gmra.mrb[4].mxu1 %vm127_vm0, %v1728_v14  ;;  %v65_v46 = vld [vmem:[%s2671_s3] sm:$0xf]  ;;  %v73_v47 = vsub.s32 1, %v68_v42  ;;  %vm2015_vm1 = vmmov 0   ;;  %s2016_s16 = smov [#allocation8]  }
  0x36   :  { %522 = vmatpush1.bf16.msra.mxu0 %v2127_v17  ;;  %192 = vmatprep.mubr.bf16.mxu0 %v2675_v0  ;;  %v2255_v48 = vrot.slane %v65_v46, %v77_v43  ;;  %v2261_v51 = vrot.slane %v65_v46, %v81_v44  ;;  %v70_v52 = vrot.slane %v65_v46, %v69_v45  ;;  %s1572_s17 = sshll.u32 %s2016_s16, 4  ;;  %s1573_s17 = int_to_ptr.vmem [resolvable:$true] %s1572_s17 }
  0x37   :  { %563 = vmatpush1.bf16.msra.mxu1 %v2129_v18  ;;  %523 = vmatprep.subr.bf16.mxu0 %v2133_v19  ;;  %v74_v55 = vrot.slane %v65_v46, %v73_v47  ;;  %s1979_s18 = scalar_lea.vmem %s1573_s17, 128  ;;  %p1984_p3 = scmp.lt.s32.totalorder %s1573_s17, %s1573_s17 }
  0x38   :  { %564 = vmatprep.subr.bf16.mxu1 %v2136_v20  ;;  %265 = vmatprep.mubr.bf16.mxu1 %v2675_v0  ;;  %p1980_p2 = scmp.ne.s32.totalorder %s1573_s17, %s1979_s18  ;;  %p1985_p4 = scmp.lt.s32.totalorder %s1979_s18, %s1979_s18 }
  0x3a   :  { %524 = vmatpush1.bf16.msra.mxu0 %v2140_v21  ;;  %p1986_p5 = por %p1985_p4, %p1984_p3 }
  0x3b   :  { %565 = vmatpush1.bf16.msra.mxu1 %v2143_v22  ;;  %525 = vmatprep.subr.bf16.mxu0 %v2148_v23 }
  0x3c   :  { %566 = vmatprep.subr.bf16.mxu1 %v2152_v24  ;;  %p1987_p6 = pnand %p1986_p5, %p1980_p2 }
  0x3d   :  { %1599 = vmatmul.mubr.msk.bf16.gmra.mrb[8].mxu0 %vm127_vm0, %v1741_v25  ;;  %1603 = vmatmul.mubr.msk.bf16.gmra.mrb[8].mxu1 %vm127_vm0, %v1741_v25 }
  0x3e   :  { %526 = vmatpush1.bf16.msra.mxu0 %v2158_v26  ;;  %202 = vmatprep.mubr.bf16.mxu0 %v2675_v0 }
  0x3f   :  { %567 = vmatpush1.bf16.msra.mxu1 %v2162_v27  ;;  %527 = vmatprep.subr.bf16.mxu0 %v2164_v28 }
  0x40   :  { %568 = vmatprep.subr.bf16.mxu1 %v2167_v29  ;;  %275 = vmatprep.mubr.bf16.mxu1 %v2675_v0 }
  0x42   :  { %528 = vmatpush1.bf16.msra.mxu0 %v2172_v30 }
  0x43   :  { %569 = vmatpush1.bf16.msra.mxu1 %v2174_v31  ;;  %529 = vmatprep.subr.bf16.mxu0 %v2182_v33 }
  0x44   :  { %570 = vmatprep.subr.bf16.mxu1 %v2186_v34 }
  0x45   :  { %1600 = vmatmul.mubr.msk.bf16.gmra.mrb[12].mxu0 %vm127_vm0, %v1754_v32  ;;  %1604 = vmatmul.mubr.msk.bf16.gmra.mrb[12].mxu1 %vm127_vm0, %v1754_v32 }
  0x46   :  { %530 = vmatpush1.bf16.msra.mxu0 %v2188_v35  ;;  %549 = vmatprep.mubr.bf16.mxu0 %v2675_v0 }
  0x47   :  { %571 = vmatpush1.bf16.msra.mxu1 %v2190_v36  ;;  %531 = vmatprep.subr.bf16.mxu0 %v2192_v37 }
  0x48   :  { %572 = vmatprep.subr.bf16.mxu1 %v2195_v38  ;;  %590 = vmatprep.mubr.bf16.mxu1 %v2675_v0 }
  0x4a   :  { %532 = vmatpush1.bf16.msra.mxu0 %v2200_v39 }
  0x4b   :  { %573 = vmatpush1.bf16.msra.mxu1 %v2208_v40  ;;  %635 = vmatprep.subr.bf16.mxu0 %v2093_v6 }
  0x4c   :  { %676 = vmatprep.subr.bf16.mxu1 %v2095_v7 }
  0x4d   :  { %550 = vmatmul.mubr.bf16.vlgmr.msra.gmra.mrb[16].mxu0 %v2675_v0 }
  0x4e   :  { %591 = vmatmul.mubr.bf16.vlgmr.msra.gmra.mrb[16].mxu1 %v2675_v0  ;;  %636 = vmatpush1.bf16.msra.mxu0 %v2097_v8 }
  0x4f   :  { %677 = vmatpush1.bf16.msra.mxu1 %v2100_v9  ;;  %637 = vmatprep.subr.bf16.mxu0 %v2104_v10 }
  0x50   :  { %678 = vmatprep.subr.bf16.mxu1 %v2108_v11  ;;  %667 = vmatprep.mubr.bf16.mxu0 %v2675_v0 }
  0x51   :  { %708 = vmatprep.mubr.bf16.mxu1 %v2675_v0 }
  0x52   :  { %638 = vmatpush1.bf16.msra.mxu0 %v2110_v12 }
  0x53   :  { %679 = vmatpush1.bf16.msra.mxu1 %v2112_v13  ;;  %639 = vmatprep.subr.bf16.mxu0 %v2121_v15 }
  0x54   :  { %680 = vmatprep.subr.bf16.mxu1 %v2124_v16 }
  0x56   :  { %640 = vmatpush1.bf16.msra.mxu0 %v2127_v17 }
  0x57   :  { %681 = vmatpush1.bf16.msra.mxu1 %v2129_v18  ;;  %641 = vmatprep.subr.bf16.mxu0 %v2133_v19 }
  0x58   :  { %682 = vmatprep.subr.bf16.mxu1 %v2136_v20 }
  0x5a   :  { %642 = vmatpush1.bf16.msra.mxu0 %v2140_v21 }
  0x5b   :  { %683 = vmatpush1.bf16.msra.mxu1 %v2143_v22  ;;  %643 = vmatprep.subr.bf16.mxu0 %v2148_v23 }
  0x5c   :  { %684 = vmatprep.subr.bf16.mxu1 %v2152_v24 }
  0x5e   :  { %644 = vmatpush1.bf16.msra.mxu0 %v2158_v26 }
  0x5f   :  { %685 = vmatpush1.bf16.msra.mxu1 %v2162_v27  ;;  %645 = vmatprep.subr.bf16.mxu0 %v2164_v28 }
  0x60   :  { %686 = vmatprep.subr.bf16.mxu1 %v2167_v29 }
  0x62   :  { %646 = vmatpush1.bf16.msra.mxu0 %v2172_v30 }
  0x63   :  { %687 = vmatpush1.bf16.msra.mxu1 %v2174_v31  ;;  %647 = vmatprep.subr.bf16.mxu0 %v2182_v33 }
  0x64   :  { %688 = vmatprep.subr.bf16.mxu1 %v2186_v34 }
  0x66   :  { %648 = vmatpush1.bf16.msra.mxu0 %v2188_v35 }
  0x67   :  { %689 = vmatpush1.bf16.msra.mxu1 %v2190_v36  ;;  %649 = vmatprep.subr.bf16.mxu0 %v2192_v37 }
  0x68   :  { %690 = vmatprep.subr.bf16.mxu1 %v2195_v38 }
  0x6a   :  { %650 = vmatpush1.bf16.msra.mxu0 %v2200_v39 }
  0x6b   :  { %691 = vmatpush1.bf16.msra.mxu1 %v2208_v40  ;;  %753 = vmatprep.subr.bf16.mxu0 %v2093_v6 }
  0x6c   :  { %794 = vmatprep.subr.bf16.mxu1 %v2095_v7 }
 0x100   :  { %v2257_v49 = vpop.f32.mrb[0].mxu0  ;;  %v2259_v50 = vpop.f32.mrb[0].mxu1 }
 0x101   :  { %v176_v53 = vpop.f32.mrb[1].mxu0  ;;  %v249_v54 = vpop.f32.mrb[1].mxu1 }
 0x102   :  { %v178_v56 = vpop.f32.mrb[2].mxu0  ;;  %v251_v57 = vpop.f32.mrb[2].mxu1 }
 0x103   :  { %v2263_v58 = vadd.f32 %v178_v56, %v70_v52  ;;  %v180_v59 = vpop.f32.mrb[3].mxu0  ;;  %v2266_v60 = vadd.f32 %v251_v57, %v2255_v48  ;;  %v253_v61 = vpop.f32.mrb[3].mxu1 }
 0x104   :  { %v2268_v62 = vadd.f32 %v180_v59, %v74_v55  ;;  %v2271_v63 = vadd.f32 %v253_v61, %v2261_v51 }
 0x108   :  { %v184_v1 = vpop.f32.mrb[4].mxu0  ;;  %v257_v2 = vpop.f32.mrb[4].mxu1 }
 0x109   :  { %v2273_v3 = vadd.f32 %v184_v1, %v70_v52  ;;  %v186_v4 = vpop.f32.mrb[5].mxu0  ;;  %v2276_v5 = vadd.f32 %v257_v2, %v2255_v48  ;;  %v259_v14 = vpop.f32.mrb[5].mxu1 }
 0x10a   :  { %v2278_v25 = vadd.f32 %v186_v4, %v74_v55  ;;  %v188_v32 = vpop.f32.mrb[6].mxu0  ;;  %v2281_v41 = vadd.f32 %v259_v14, %v2261_v51  ;;  %v261_v42 = vpop.f32.mrb[6].mxu1 }
 0x10b   :  { %v2283_v43 = vadd.f32 %v188_v32, %v70_v52  ;;  %v190_v44 = vpop.f32.mrb[7].mxu0  ;;  %v2286_v45 = vadd.f32 %v261_v42, %v2255_v48  ;;  %v263_v46 = vpop.f32.mrb[7].mxu1 }
 0x10c   :  { %2677 = vst [vmem:[#allocation12_spill] sm:$0xff] %v2281_v41  ;;  %v2288_v47 = vadd.f32 %v190_v44, %v74_v55  ;;  %v2291_v56 = vadd.f32 %v263_v46, %v2261_v51 }
 0x10d   :  { %2678 = vst [vmem:[#allocation13_spill] sm:$0xff] %v2283_v43  ;;  %2679 = vst [vmem:[#allocation14_spill] sm:$0xff] %v2286_v45 }
 0x10e   :  { %2680 = vst [vmem:[#allocation15_spill] sm:$0xff] %v2288_v47  ;;  %2681 = vst [vmem:[#allocation16_spill] sm:$0xff] %v2291_v56 }
 0x110   :  { %v194_v57 = vpop.f32.mrb[8].mxu0  ;;  %v267_v59 = vpop.f32.mrb[8].mxu1 }
 0x111   :  { %v2293_v61 = vadd.f32 %v194_v57, %v70_v52  ;;  %v196_v1 = vpop.f32.mrb[9].mxu0  ;;  %v2296_v2 = vadd.f32 %v267_v59, %v2255_v48  ;;  %v269_v4 = vpop.f32.mrb[9].mxu1 }
 0x112   :  { %v2298_v14 = vadd.f32 %v196_v1, %v74_v55  ;;  %v198_v32 = vpop.f32.mrb[10].mxu0  ;;  %v2301_v42 = vadd.f32 %v269_v4, %v2261_v51  ;;  %v271_v44 = vpop.f32.mrb[10].mxu1 }
 0x113   :  { %2682 = vst [vmem:[#allocation17_spill] sm:$0xff] %v2293_v61  ;;  %2683 = vst [vmem:[#allocation18_spill] sm:$0xff] %v2296_v2  ;;  %v2303_v0 = vadd.f32 %v198_v32, %v70_v52  ;;  %v200_v46 = vpop.f32.mrb[11].mxu0  ;;  %v2306_v56 = vadd.f32 %v271_v44, %v2255_v48  ;;  %v273_v57 = vpop.f32.mrb[11].mxu1 }
 0x114   :  { %2684 = vst [vmem:[#allocation19_spill] sm:$0xff] %v2298_v14  ;;  %2685 = vst [vmem:[#allocation20_spill] sm:$0xff] %v2301_v42  ;;  %v2308_v61 = vadd.f32 %v200_v46, %v74_v55  ;;  %v2311_v59 = vadd.f32 %v273_v57, %v2261_v51 }
 0x115   :  { %2686 = vst [vmem:[#allocation21_spill] sm:$0xff] %v2303_v0  ;;  %2687 = vst [vmem:[#allocation22_spill] sm:$0xff] %v2306_v56 }
 0x116   :  { %2688 = vst [vmem:[#allocation23_spill] sm:$0xff] %v2308_v61  ;;  %2689 = vst [vmem:[#allocation24_spill] sm:$0xff] %v2311_v59 }
 0x118   :  { %v204_v2 = vpop.f32.mrb[12].mxu0  ;;  %v277_v1 = vpop.f32.mrb[12].mxu1 }
 0x119   :  { %v2313_v14 = vadd.f32 %v204_v2, %v70_v52  ;;  %v206_v47 = vpop.f32.mrb[13].mxu0  ;;  %v2316_v4 = vadd.f32 %v277_v1, %v2255_v48  ;;  %v279_v32 = vpop.f32.mrb[13].mxu1 }
 0x11a   :  { %v2318_v0 = vadd.f32 %v206_v47, %v74_v55  ;;  %v208_v42 = vpop.f32.mrb[14].mxu0  ;;  %v2321_v44 = vadd.f32 %v279_v32, %v2261_v51  ;;  %v281_v46 = vpop.f32.mrb[14].mxu1  ;;  %v175_v47 = vadd.f32 %v2257_v49, %v70_v52  ;;  %v248_v32 = vadd.f32 %v2259_v50, %v2255_v48 }
 0x11b   :  { %2690 = vst [vmem:[#allocation25_spill] sm:$0xff] %v2313_v14  ;;  %2691 = vst [vmem:[#allocation26_spill] sm:$0xff] %v2316_v4  ;;  %v2323_v61 = vadd.f32 %v208_v42, %v70_v52  ;;  %v210_v57 = vpop.f32.mrb[15].mxu0  ;;  %v2326_v59 = vadd.f32 %v281_v46, %v2255_v48  ;;  %v283_v2 = vpop.f32.mrb[15].mxu1  ;;  %v250_v42 = vadd.f32 %v249_v54, %v2261_v51 }
 0x11c   :  { %2692 = vst [vmem:[#allocation27_spill] sm:$0xff] %v2318_v0  ;;  %2693 = vst [vmem:[#allocation28_spill] sm:$0xff] %v2321_v44  ;;  %v2328_v14 = vadd.f32 %v210_v57, %v74_v55  ;;  %v2331_v1 = vadd.f32 %v283_v2, %v2261_v51  ;;  %v177_v0 = vadd.f32 %v176_v53, %v74_v55 }
 0x11d   :  { %2694 = vst [vmem:[#allocation29_spill] sm:$0xff] %v2323_v61  ;;  %2695 = vst [vmem:[#allocation30_spill] sm:$0xff] %v2326_v59 }
 0x11e   :  { %2696 = vst [vmem:[#allocation31_spill] sm:$0xff] %v2328_v14  ;;  %2697 = vst [vmem:[#allocation32_spill] sm:$0xff] %v2331_v1 }
 0x120   :  { %v551_v44 = vpop.f32.mrb[16].mxu0 }
 0x121   :  { %v599_v61 = vadd.f32 %v551_v44, %v175_v47  ;;  %v592_v4 = vpop.f32.mrb[16].mxu1  ;;  %v553_v56 = vpop.f32.mrb[17].mxu0 }
 0x122   :  { %v601_v46 = vadd.f32 %v592_v4, %v248_v32  ;;  %v600_v59 = vadd.f32 %v553_v56, %v177_v0  ;;  %v594_v45 = vpop.f32.mrb[17].mxu1  ;;  %v555_v57 = vpop.f32.mrb[18].mxu0 }
 0x123   :  { %v1637_v14 = vmul.f32 -1.442695, %v599_v61  ;;  %v602_v43 = vadd.f32 %v594_v45, %v250_v42  ;;  %v556_v2 = vpop.f32.mrb[19].mxu0  ;;  %v596_v1 = vpop.f32.mrb[18].mxu1 }
 0x124   :  { %v1638_v41 = vmul.f32 -1.442695, %v600_v59  ;;  %v597_v49 = vpop.f32.mrb[19].mxu1  ;;  %v1639_v52 = vmul.f32 -1.442695, %v601_v46 }
 0x125   :  { %1775 = vpow2.f32 %v1637_v14 }
 0x126   :  { %1777 = vpow2.f32 %v1638_v41 }
 0x127   :  { %1779 = vpow2.f32 %v1639_v52 }
 0x128   :  { %1781 = vtanh.f32 %v602_v43  ;;  %v2698_v43 = vmov 0  }
 0x12f   :  { %v1776_v48 = vpop.eup %1775 }
 0x130   :  { %v612_v50 = vadd.f32 1.0, %v1776_v48  ;;  %v1778_v51 = vpop.eup %1777 }
 0x131   :  { %v613_v53 = vadd.f32 1.0, %v1778_v51  ;;  %v1780_v0 = vpop.eup %1779 }
 0x132   :  { %1783 = vrcp.f32 %v612_v50  ;;  %v1782_v54 = vpop.eup %1781  ;;  %v614_v61 = vadd.f32 1.0, %v1780_v0 }
 0x133   :  { %1785 = vrcp.f32 %v613_v53 }
 0x134   :  { %1787 = vrcp.f32 %v614_v61 }
 0x13c   :  { %v1784_v55 = vpop.eup %1783 }
 0x13d   :  { %v623_v56 = vmul.f32 %v1784_v55, %v1782_v54  ;;  %v1786_v45 = vpop.eup %1785 }
 0x13e   :  { %v622_v4 = vmul.f32 0.0, %v1786_v45  ;;  %v1788_v41 = vpop.eup %1787 }
 0x140   :  { %v2337_v59 = vadd.f32 %v623_v56, %v622_v4 }
 0x142   :  { %1789 = vtanh.f32 %v2337_v59 }
 0x14c   :  { %v1790_v14 = vpop.eup %1789 }
 0x14d   :  { %v626_v44 = vmul.f32 %v1790_v14, %v1788_v41 }
 0x14f   :  { %v634_v1 = vpack.c.bf16 %v626_v44, %v626_v44 }
 0x151   :  { %668 = vmatmul.mubr.bf16.vlgmr.msra.gmra.mrb[20].mxu0 %v634_v1  ;;  %709 = vmatmul.mubr.bf16.vlgmr.msra.gmra.mrb[20].mxu1 %v634_v1 }
 0x152   :  { %754 = vmatpush1.bf16.msra.mxu0 %v2097_v8  ;;  %795 = vmatpush1.bf16.msra.mxu1 %v2100_v9 }
 0x153   :  { %755 = vmatprep.subr.bf16.mxu0 %v2104_v10  ;;  %796 = vmatprep.subr.bf16.mxu1 %v2108_v11 }
 0x154   :  { %785 = vmatprep.mubr.bf16.mxu0 %v2698_v43  ;;  %826 = vmatprep.mubr.bf16.mxu1 %v2698_v43 }
 0x156   :  { %756 = vmatpush1.bf16.msra.mxu0 %v2110_v12  ;;  %797 = vmatpush1.bf16.msra.mxu1 %v2112_v13 }
 0x157   :  { %757 = vmatprep.subr.bf16.mxu0 %v2121_v15  ;;  %798 = vmatprep.subr.bf16.mxu1 %v2124_v16 }
 0x15a   :  { %758 = vmatpush1.bf16.msra.mxu0 %v2127_v17  ;;  %799 = vmatpush1.bf16.msra.mxu1 %v2129_v18 }
 0x15b   :  { %759 = vmatprep.subr.bf16.mxu0 %v2133_v19  ;;  %800 = vmatprep.subr.bf16.mxu1 %v2136_v20 }
 0x15e   :  { %760 = vmatpush1.bf16.msra.mxu0 %v2140_v21  ;;  %801 = vmatpush1.bf16.msra.mxu1 %v2143_v22 }
 0x15f   :  { %761 = vmatprep.subr.bf16.mxu0 %v2148_v23  ;;  %802 = vmatprep.subr.bf16.mxu1 %v2152_v24 }
 0x162   :  { %762 = vmatpush1.bf16.msra.mxu0 %v2158_v26  ;;  %803 = vmatpush1.bf16.msra.mxu1 %v2162_v27 }
 0x163   :  { %763 = vmatprep.subr.bf16.mxu0 %v2164_v28  ;;  %804 = vmatprep.subr.bf16.mxu1 %v2167_v29 }
 0x166   :  { %764 = vmatpush1.bf16.msra.mxu0 %v2172_v30  ;;  %805 = vmatpush1.bf16.msra.mxu1 %v2174_v31 }
 0x167   :  { %765 = vmatprep.subr.bf16.mxu0 %v2182_v33  ;;  %806 = vmatprep.subr.bf16.mxu1 %v2186_v34 }
 0x16a   :  { %766 = vmatpush1.bf16.msra.mxu0 %v2188_v35  ;;  %807 = vmatpush1.bf16.msra.mxu1 %v2190_v36 }
 0x16b   :  { %767 = vmatprep.subr.bf16.mxu0 %v2192_v37  ;;  %808 = vmatprep.subr.bf16.mxu1 %v2195_v38 }
 0x16e   :  { %768 = vmatpush1.bf16.msra.mxu0 %v2200_v39  ;;  %809 = vmatpush1.bf16.msra.mxu1 %v2208_v40 }
 0x16f   :  { %871 = vmatprep.subr.bf16.mxu0 %v2093_v6  ;;  %912 = vmatprep.subr.bf16.mxu1 %v2095_v7 }
 0x224   :  { %v669_v47 = vpop.f32.mrb[20].mxu0  ;;  %v710_v32 = vpop.f32.mrb[20].mxu1 }
 0x225   :  { %v717_v42 = vadd.f32 %v669_v47, %v2263_v58  ;;  %v719_v46 = vadd.f32 %v710_v32, %v2266_v60  ;;  %v671_v57 = vpop.f32.mrb[21].mxu0  ;;  %v712_v2 = vpop.f32.mrb[21].mxu1 }
 0x226   :  { %v718_v49 = vadd.f32 %v671_v57, %v2268_v62  ;;  %v720_v52 = vadd.f32 %v712_v2, %v2271_v63  ;;  %v673_v48 = vpop.f32.mrb[22].mxu0  ;;  %v714_v50 = vpop.f32.mrb[22].mxu1 }
 0x227   :  { %v1640_v51 = vmul.f32 -1.442695, %v717_v42  ;;  %v674_v53 = vpop.f32.mrb[23].mxu0  ;;  %v715_v0 = vpop.f32.mrb[23].mxu1  ;;  %v1642_v55 = vmul.f32 -1.442695, %v719_v46 }
 0x228   :  { %v1641_v54 = vmul.f32 -1.442695, %v718_v49 }
 0x229   :  { %1791 = vpow2.f32 %v1640_v51  ;;  %v2699_v51 = vld [vmem:[#allocation12_spill] sm:$0xff] }
 0x22a   :  { %1793 = vpow2.f32 %v1641_v54 }
 0x22b   :  { %1795 = vtanh.f32 %v720_v52 }
 0x22c   :  { %1797 = vpow2.f32 %v1642_v55 }
 0x233   :  { %v1792_v56 = vpop.eup %1791 }
 0x234   :  { %v730_v45 = vadd.f32 1.0, %v1792_v56  ;;  %v1794_v58 = vpop.eup %1793 }
 0x235   :  { %v731_v60 = vadd.f32 1.0, %v1794_v58  ;;  %v1796_v62 = vpop.eup %1795 }
 0x236   :  { %1799 = vrcp.f32 %v730_v45  ;;  %v1798_v61 = vpop.eup %1797 }
 0x237   :  { %1801 = vrcp.f32 %v731_v60  ;;  %v732_v14 = vadd.f32 1.0, %v1798_v61 }
 0x239   :  { %1803 = vrcp.f32 %v732_v14 }
 0x240   :  { %v1800_v63 = vpop.eup %1799 }
 0x241   :  { %v741_v4 = vmul.f32 %v1800_v63, %v1796_v62  ;;  %v1802_v41 = vpop.eup %1801 }
 0x242   :  { %v740_v44 = vmul.f32 %v1802_v41, %v2337_v59 }
 0x243   :  { %v1804_v47 = vpop.eup %1803 }
 0x244   :  { %v2379_v1 = vadd.f32 %v741_v4, %v740_v44 }
 0x246   :  { %1805 = vtanh.f32 %v2379_v1 }
 0x250   :  { %v1806_v32 = vpop.eup %1805 }
 0x251   :  { %v744_v42 = vmul.f32 %v1806_v32, %v1804_v47 }
 0x253   :  { %v752_v46 = vpack.c.bf16 %v744_v42, %v744_v42 }
 0x255   :  { %786 = vmatmul.mubr.bf16.vlgmr.msra.gmra.mrb[24].mxu0 %v752_v46  ;;  %827 = vmatmul.mubr.bf16.vlgmr.msra.gmra.mrb[24].mxu1 %v752_v46 }
 0x256   :  { %872 = vmatpush1.bf16.msra.mxu0 %v2097_v8  ;;  %913 = vmatpush1.bf16.msra.mxu1 %v2100_v9 }
 0x257   :  { %873 = vmatprep.subr.bf16.mxu0 %v2104_v10  ;;  %914 = vmatprep.subr.bf16.mxu1 %v2108_v11 }
 0x258   :  { %903 = vmatprep.mubr.bf16.mxu0 %v2698_v43  ;;  %944 = vmatprep.mubr.bf16.mxu1 %v2698_v43 }
 0x25a   :  { %874 = vmatpush1.bf16.msra.mxu0 %v2110_v12  ;;  %915 = vmatpush1.bf16.msra.mxu1 %v2112_v13 }
 0x25b   :  { %875 = vmatprep.subr.bf16.mxu0 %v2121_v15  ;;  %916 = vmatprep.subr.bf16.mxu1 %v2124_v16 }
 0x25e   :  { %876 = vmatpush1.bf16.msra.mxu0 %v2127_v17  ;;  %917 = vmatpush1.bf16.msra.mxu1 %v2129_v18 }
 0x25f   :  { %877 = vmatprep.subr.bf16.mxu0 %v2133_v19  ;;  %918 = vmatprep.subr.bf16.mxu1 %v2136_v20 }
 0x262   :  { %878 = vmatpush1.bf16.msra.mxu0 %v2140_v21  ;;  %919 = vmatpush1.bf16.msra.mxu1 %v2143_v22 }
 0x263   :  { %879 = vmatprep.subr.bf16.mxu0 %v2148_v23  ;;  %920 = vmatprep.subr.bf16.mxu1 %v2152_v24 }
 0x266   :  { %880 = vmatpush1.bf16.msra.mxu0 %v2158_v26  ;;  %921 = vmatpush1.bf16.msra.mxu1 %v2162_v27 }
 0x267   :  { %881 = vmatprep.subr.bf16.mxu0 %v2164_v28  ;;  %922 = vmatprep.subr.bf16.mxu1 %v2167_v29 }
 0x26a   :  { %882 = vmatpush1.bf16.msra.mxu0 %v2172_v30  ;;  %923 = vmatpush1.bf16.msra.mxu1 %v2174_v31 }
 0x26b   :  { %883 = vmatprep.subr.bf16.mxu0 %v2182_v33  ;;  %924 = vmatprep.subr.bf16.mxu1 %v2186_v34 }
 0x26e   :  { %884 = vmatpush1.bf16.msra.mxu0 %v2188_v35  ;;  %925 = vmatpush1.bf16.msra.mxu1 %v2190_v36 }
 0x26f   :  { %885 = vmatprep.subr.bf16.mxu0 %v2192_v37  ;;  %926 = vmatprep.subr.bf16.mxu1 %v2195_v38 }
 0x272   :  { %886 = vmatpush1.bf16.msra.mxu0 %v2200_v39  ;;  %927 = vmatpush1.bf16.msra.mxu1 %v2208_v40 }
 0x273   :  { %989 = vmatprep.subr.bf16.mxu0 %v2093_v6  ;;  %1030 = vmatprep.subr.bf16.mxu1 %v2095_v7 }
 0x328   :  { %v787_v59 = vpop.f32.mrb[24].mxu0  ;;  %v828_v57 = vpop.f32.mrb[24].mxu1 }
 0x329   :  { %v835_v2 = vadd.f32 %v787_v59, %v2273_v3  ;;  %v837_v49 = vadd.f32 %v828_v57, %v2276_v5  ;;  %v789_v52 = vpop.f32.mrb[25].mxu0  ;;  %v830_v48 = vpop.f32.mrb[25].mxu1 }
 0x32a   :  { %v836_v50 = vadd.f32 %v789_v52, %v2278_v25  ;;  %v838_v53 = vadd.f32 %v830_v48, %v2699_v51  ;;  %v791_v0 = vpop.f32.mrb[26].mxu0  ;;  %v832_v54 = vpop.f32.mrb[26].mxu1  ;;  %v2701_v48 = vld [vmem:[#allocation14_spill] sm:$0xff] }
 0x32b   :  { %v1643_v55 = vmul.f32 -1.442695, %v835_v2  ;;  %v792_v56 = vpop.f32.mrb[27].mxu0  ;;  %v833_v45 = vpop.f32.mrb[27].mxu1  ;;  %v1645_v60 = vmul.f32 -1.442695, %v837_v49 }
 0x32c   :  { %v1644_v58 = vmul.f32 -1.442695, %v836_v50  ;;  %v2700_v49 = vld [vmem:[#allocation13_spill] sm:$0xff]  ;;  %v2702_v0 = vld [vmem:[#allocation15_spill] sm:$0xff] }
 0x32d   :  { %1807 = vpow2.f32 %v1643_v55  ;;  %v2703_v55 = vld [vmem:[#allocation16_spill] sm:$0xff] }
 0x32e   :  { %1809 = vpow2.f32 %v1644_v58 }
 0x32f   :  { %1811 = vtanh.f32 %v838_v53 }
 0x330   :  { %1813 = vpow2.f32 %v1645_v60 }
 0x337   :  { %v1808_v62 = vpop.eup %1807 }
 0x338   :  { %v848_v61 = vadd.f32 1.0, %v1808_v62  ;;  %v1810_v3 = vpop.eup %1809 }
 0x339   :  { %v849_v5 = vadd.f32 1.0, %v1810_v3  ;;  %v1812_v25 = vpop.eup %1811 }
 0x33a   :  { %1815 = vrcp.f32 %v848_v61  ;;  %v1814_v63 = vpop.eup %1813 }
 0x33b   :  { %1817 = vrcp.f32 %v849_v5  ;;  %v850_v44 = vadd.f32 1.0, %v1814_v63 }
 0x33d   :  { %1819 = vrcp.f32 %v850_v44 }
 0x344   :  { %v1816_v4 = vpop.eup %1815 }
 0x345   :  { %v859_v41 = vmul.f32 %v1816_v4, %v1812_v25  ;;  %v1818_v14 = vpop.eup %1817 }
 0x346   :  { %v858_v47 = vmul.f32 %v1818_v14, %v2379_v1 }
 0x347   :  { %v1820_v42 = vpop.eup %1819 }
 0x348   :  { %v2421_v32 = vadd.f32 %v859_v41, %v858_v47 }
 0x34a   :  { %1821 = vtanh.f32 %v2421_v32 }
 0x354   :  { %v1822_v46 = vpop.eup %1821 }
 0x355   :  { %v862_v59 = vmul.f32 %v1822_v46, %v1820_v42 }
 0x357   :  { %v870_v57 = vpack.c.bf16 %v862_v59, %v862_v59 }
 0x359   :  { %904 = vmatmul.mubr.bf16.vlgmr.msra.gmra.mrb[28].mxu0 %v870_v57  ;;  %945 = vmatmul.mubr.bf16.vlgmr.msra.gmra.mrb[28].mxu1 %v870_v57 }
 0x35a   :  { %990 = vmatpush1.bf16.msra.mxu0 %v2097_v8  ;;  %1031 = vmatpush1.bf16.msra.mxu1 %v2100_v9 }
 0x35b   :  { %991 = vmatprep.subr.bf16.mxu0 %v2104_v10  ;;  %1032 = vmatprep.subr.bf16.mxu1 %v2108_v11 }
 0x35c   :  { %1021 = vmatprep.mubr.bf16.mxu0 %v2698_v43  ;;  %1062 = vmatprep.mubr.bf16.mxu1 %v2698_v43 }
 0x35e   :  { %992 = vmatpush1.bf16.msra.mxu0 %v2110_v12  ;;  %1033 = vmatpush1.bf16.msra.mxu1 %v2112_v13 }
 0x35f   :  { %993 = vmatprep.subr.bf16.mxu0 %v2121_v15  ;;  %1034 = vmatprep.subr.bf16.mxu1 %v2124_v16 }
 0x362   :  { %994 = vmatpush1.bf16.msra.mxu0 %v2127_v17  ;;  %1035 = vmatpush1.bf16.msra.mxu1 %v2129_v18 }
 0x363   :  { %995 = vmatprep.subr.bf16.mxu0 %v2133_v19  ;;  %1036 = vmatprep.subr.bf16.mxu1 %v2136_v20 }
 0x366   :  { %996 = vmatpush1.bf16.msra.mxu0 %v2140_v21  ;;  %1037 = vmatpush1.bf16.msra.mxu1 %v2143_v22 }
 0x367   :  { %997 = vmatprep.subr.bf16.mxu0 %v2148_v23  ;;  %1038 = vmatprep.subr.bf16.mxu1 %v2152_v24 }
 0x36a   :  { %998 = vmatpush1.bf16.msra.mxu0 %v2158_v26  ;;  %1039 = vmatpush1.bf16.msra.mxu1 %v2162_v27 }
 0x36b   :  { %999 = vmatprep.subr.bf16.mxu0 %v2164_v28  ;;  %1040 = vmatprep.subr.bf16.mxu1 %v2167_v29 }
 0x36e   :  { %1000 = vmatpush1.bf16.msra.mxu0 %v2172_v30  ;;  %1041 = vmatpush1.bf16.msra.mxu1 %v2174_v31 }
 0x36f   :  { %1001 = vmatprep.subr.bf16.mxu0 %v2182_v33  ;;  %1042 = vmatprep.subr.bf16.mxu1 %v2186_v34 }
 0x372   :  { %1002 = vmatpush1.bf16.msra.mxu0 %v2188_v35  ;;  %1043 = vmatpush1.bf16.msra.mxu1 %v2190_v36 }
 0x373   :  { %1003 = vmatprep.subr.bf16.mxu0 %v2192_v37  ;;  %1044 = vmatprep.subr.bf16.mxu1 %v2195_v38 }
 0x376   :  { %1004 = vmatpush1.bf16.msra.mxu0 %v2200_v39  ;;  %1045 = vmatpush1.bf16.msra.mxu1 %v2208_v40 }
 0x377   :  { %1107 = vmatprep.subr.bf16.mxu0 %v2093_v6  ;;  %1148 = vmatprep.subr.bf16.mxu1 %v2095_v7 }
 0x42c   :  { %v905_v1 = vpop.f32.mrb[28].mxu0  ;;  %v946_v2 = vpop.f32.mrb[28].mxu1 }
 0x42d   :  { %v953_v52 = vadd.f32 %v905_v1, %v2700_v49  ;;  %v955_v50 = vadd.f32 %v946_v2, %v2701_v48  ;;  %v907_v51 = vpop.f32.mrb[29].mxu0  ;;  %v948_v53 = vpop.f32.mrb[29].mxu1 }
 0x42e   :  { %v954_v54 = vadd.f32 %v907_v51, %v2702_v0  ;;  %v956_v56 = vadd.f32 %v948_v53, %v2703_v55  ;;  %v909_v45 = vpop.f32.mrb[30].mxu0  ;;  %v950_v58 = vpop.f32.mrb[30].mxu1 }
 0x42f   :  { %v1646_v60 = vmul.f32 -1.442695, %v953_v52  ;;  %v910_v62 = vpop.f32.mrb[31].mxu0  ;;  %v951_v61 = vpop.f32.mrb[31].mxu1  ;;  %v1648_v7 = vmul.f32 -1.442695, %v955_v50 }
 0x430   :  { %v1647_v6 = vmul.f32 -1.442695, %v954_v54  ;;  %v2515_v45 = vld [vmem:[#allocation3 + $0x8] ss:$16 sps:$4 sm:$0xff]   ;;  %v2518_v58 = vld [vmem:[#allocation3 + $0x24] ss:$16 sps:$4 sm:$0xff]  }
 0x431   :  { %1823 = vpow2.f32 %v1646_v60  ;;  %v2521_v60 = vld [vmem:[#allocation3 + $0x2c] ss:$16 sps:$4 sm:$0xff]   ;;  %v2526_v62 = vld [vmem:[#allocation3 + $0x20] ss:$16 sps:$4 sm:$0xff]   ;;  %v2529_v61 = vld [vmem:[#allocation3 + $0x28] ss:$16 sps:$4 sm:$0xff]  }
 0x432   :  { %1825 = vpow2.f32 %v1647_v6  ;;  %v2532_v6 = vld [vmem:[#allocation3 + $0x44] ss:$16 sps:$4 sm:$0xff]  }
 0x433   :  { %1827 = vtanh.f32 %v956_v56  ;;  %v2512_v56 = vld [vmem:[#allocation3] ss:$16 sps:$4 sm:$0xff]  }
 0x434   :  { %1829 = vpow2.f32 %v1648_v7  ;;  %v2535_v7 = vld [vmem:[#allocation3 + $0x4c] ss:$16 sps:$4 sm:$0xff]  }
 0x43b   :  { %v1824_v3 = vpop.eup %1823 }
 0x43c   :  { %v966_v5 = vadd.f32 1.0, %v1824_v3  ;;  %v1826_v25 = vpop.eup %1825  ;;  %v2538_v3 = vld [vmem:[#allocation3 + $0x40] ss:$16 sps:$4 sm:$0xff]  }
 0x43d   :  { %v967_v63 = vadd.f32 1.0, %v1826_v25  ;;  %v1828_v4 = vpop.eup %1827  ;;  %v2544_v25 = vld [vmem:[#allocation3 + $0x64] ss:$16 sps:$4 sm:$0xff]  }
 0x43e   :  { %1831 = vrcp.f32 %v966_v5  ;;  %v1830_v41 = vpop.eup %1829  ;;  %v2541_v5 = vld [vmem:[#allocation3 + $0x48] ss:$16 sps:$4 sm:$0xff]  }
 0x43f   :  { %1833 = vrcp.f32 %v967_v63  ;;  %v968_v42 = vadd.f32 1.0, %v1830_v41  ;;  %v2547_v63 = vld [vmem:[#allocation3 + $0x6c] ss:$16 sps:$4 sm:$0xff]   ;;  %v2553_v41 = vld [vmem:[#allocation3 + $0x68] ss:$16 sps:$4 sm:$0xff]  }
 0x441   :  { %1835 = vrcp.f32 %v968_v42  ;;  %v2565_v42 = vld [vmem:[#allocation3 + $0x88] ss:$16 sps:$4 sm:$0xff]  }
 0x448   :  { %v1832_v14 = vpop.eup %1831 }
 0x449   :  { %v977_v44 = vmul.f32 %v1832_v14, %v1828_v4  ;;  %v1834_v47 = vpop.eup %1833  ;;  %v2550_v4 = vld [vmem:[#allocation3 + $0x60] ss:$16 sps:$4 sm:$0xff]   ;;  %v2556_v14 = vld [vmem:[#allocation3 + $0x84] ss:$16 sps:$4 sm:$0xff]  }
 0x44a   :  { %v976_v46 = vmul.f32 %v1834_v47, %v2421_v32  ;;  %v2562_v47 = vld [vmem:[#allocation3 + $0x80] ss:$16 sps:$4 sm:$0xff]  }
 0x44b   :  { %v1836_v57 = vpop.eup %1835 }
 0x44c   :  { %v2463_v59 = vadd.f32 %v977_v44, %v976_v46  ;;  %v2559_v44 = vld [vmem:[#allocation3 + $0x8c] ss:$16 sps:$4 sm:$0xff]   ;;  %v2568_v46 = vld [vmem:[#allocation3 + $0xa4] ss:$16 sps:$4 sm:$0xff]  }
 0x44e   :  { %1837 = vtanh.f32 %v2463_v59 }
 0x458   :  { %v1838_v1 = vpop.eup %1837 }
 0x459   :  { %v980_v2 = vmul.f32 %v1838_v1, %v1836_v57  ;;  %v2574_v57 = vld [vmem:[#allocation3 + $0xa0] ss:$16 sps:$4 sm:$0xff]   ;;  %v2577_v1 = vld [vmem:[#allocation3 + $0xa8] ss:$16 sps:$4 sm:$0xff]  }
 0x45b   :  { %v988_v49 = vpack.c.bf16 %v980_v2, %v980_v2  ;;  %v2580_v2 = vld [vmem:[#allocation3 + $0xc4] ss:$16 sps:$4 sm:$0xff]  }
 0x45d   :  { %1022 = vmatmul.mubr.bf16.vlgmr.msra.gmra.mrb[32].mxu0 %v988_v49  ;;  %1063 = vmatmul.mubr.bf16.vlgmr.msra.gmra.mrb[32].mxu1 %v988_v49  ;;  %v2583_v49 = vld [vmem:[#allocation3 + $0xcc] ss:$16 sps:$4 sm:$0xff]  }
 0x45e   :  { %1108 = vmatpush1.bf16.msra.mxu0 %v2097_v8  ;;  %1149 = vmatpush1.bf16.msra.mxu1 %v2100_v9  ;;  %v2498_v8 = vld [vmem:[#allocation3 + $0x4] ss:$16 sps:$4 sm:$0xff]   ;;  %v2501_v9 = vld [vmem:[#allocation3 + $0xc] ss:$16 sps:$4 sm:$0xff]  }
 0x45f   :  { %1109 = vmatprep.subr.bf16.mxu0 %v2104_v10  ;;  %1150 = vmatprep.subr.bf16.mxu1 %v2108_v11 }
 0x460   :  { %1139 = vmatprep.mubr.bf16.mxu0 %v2698_v43  ;;  %1180 = vmatprep.mubr.bf16.mxu1 %v2698_v43 }
 0x462   :  { %1110 = vmatpush1.bf16.msra.mxu0 %v2110_v12  ;;  %1151 = vmatpush1.bf16.msra.mxu1 %v2112_v13  ;;  %v2704_v12 = vld [vmem:[#allocation17_spill] sm:$0xff] }
 0x463   :  { %1111 = vmatprep.subr.bf16.mxu0 %v2121_v15  ;;  %1152 = vmatprep.subr.bf16.mxu1 %v2124_v16  ;;  %v2705_v15 = vld [vmem:[#allocation18_spill] sm:$0xff] }
 0x466   :  { %1112 = vmatpush1.bf16.msra.mxu0 %v2127_v17  ;;  %1153 = vmatpush1.bf16.msra.mxu1 %v2129_v18 }
 0x467   :  { %1113 = vmatprep.subr.bf16.mxu0 %v2133_v19  ;;  %1154 = vmatprep.subr.bf16.mxu1 %v2136_v20  ;;  %v2706_v19 = vld [vmem:[#allocation19_spill] sm:$0xff] }
 0x46a   :  { %1114 = vmatpush1.bf16.msra.mxu0 %v2140_v21  ;;  %1155 = vmatpush1.bf16.msra.mxu1 %v2143_v22  ;;  %v2707_v21 = vld [vmem:[#allocation20_spill] sm:$0xff] }
 0x46b   :  { %1115 = vmatprep.subr.bf16.mxu0 %v2148_v23  ;;  %1156 = vmatprep.subr.bf16.mxu1 %v2152_v24 }
 0x46e   :  { %1116 = vmatpush1.bf16.msra.mxu0 %v2158_v26  ;;  %1157 = vmatpush1.bf16.msra.mxu1 %v2162_v27 }
 0x46f   :  { %1117 = vmatprep.subr.bf16.mxu0 %v2164_v28  ;;  %1158 = vmatprep.subr.bf16.mxu1 %v2167_v29 }
 0x472   :  { %1118 = vmatpush1.bf16.msra.mxu0 %v2172_v30  ;;  %1159 = vmatpush1.bf16.msra.mxu1 %v2174_v31 }
 0x473   :  { %1119 = vmatprep.subr.bf16.mxu0 %v2182_v33  ;;  %1160 = vmatprep.subr.bf16.mxu1 %v2186_v34 }
 0x476   :  { %1120 = vmatpush1.bf16.msra.mxu0 %v2188_v35  ;;  %1161 = vmatpush1.bf16.msra.mxu1 %v2190_v36 }
 0x477   :  { %1121 = vmatprep.subr.bf16.mxu0 %v2192_v37  ;;  %1162 = vmatprep.subr.bf16.mxu1 %v2195_v38 }
 0x47a   :  { %1122 = vmatpush1.bf16.msra.mxu0 %v2200_v39  ;;  %1163 = vmatpush1.bf16.msra.mxu1 %v2208_v40 }
 0x47b   :  { %1225 = vmatprep.subr.bf16.mxu0 %v2498_v8  ;;  %1266 = vmatprep.subr.bf16.mxu1 %v2501_v9 }
 0x530   :  { %v1023_v10 = vpop.f32.mrb[32].mxu0  ;;  %v1064_v11 = vpop.f32.mrb[32].mxu1 }
 0x531   :  { %v1071_v13 = vadd.f32 %v1023_v10, %v2704_v12  ;;  %v1073_v16 = vadd.f32 %v1064_v11, %v2705_v15  ;;  %v1025_v17 = vpop.f32.mrb[33].mxu0  ;;  %v1066_v18 = vpop.f32.mrb[33].mxu1  ;;  %v2586_v10 = vld [vmem:[#allocation3 + $0xc0] ss:$16 sps:$4 sm:$0xff]   ;;  %v2589_v11 = vld [vmem:[#allocation3 + $0xc8] ss:$16 sps:$4 sm:$0xff]  }
 0x532   :  { %v1072_v20 = vadd.f32 %v1025_v17, %v2706_v19  ;;  %v1074_v22 = vadd.f32 %v1066_v18, %v2707_v21  ;;  %v1027_v23 = vpop.f32.mrb[34].mxu0  ;;  %v1068_v24 = vpop.f32.mrb[34].mxu1  ;;  %v2592_v12 = vld [vmem:[#allocation3 + $0xe4] ss:$16 sps:$4 sm:$0xff]   ;;  %v2709_v19 = vld [vmem:[#allocation22_spill] sm:$0xff] }
 0x533   :  { %v1649_v26 = vmul.f32 -1.442695, %v1071_v13  ;;  %v1028_v27 = vpop.f32.mrb[35].mxu0  ;;  %v1069_v28 = vpop.f32.mrb[35].mxu1  ;;  %v1651_v30 = vmul.f32 -1.442695, %v1073_v16 }
 0x534   :  { %v1650_v29 = vmul.f32 -1.442695, %v1072_v20  ;;  %v2595_v13 = vld [vmem:[#allocation3 + $0xec] ss:$16 sps:$4 sm:$0xff]   ;;  %v2708_v17 = vld [vmem:[#allocation21_spill] sm:$0xff]  ;;  %v2710_v23 = vld [vmem:[#allocation23_spill] sm:$0xff] }
 0x535   :  { %1839 = vpow2.f32 %v1649_v26  ;;  %v2711_v26 = vld [vmem:[#allocation24_spill] sm:$0xff] }
 0x536   :  { %1841 = vpow2.f32 %v1650_v29 }
 0x537   :  { %1843 = vtanh.f32 %v1074_v22 }
 0x538   :  { %1845 = vpow2.f32 %v1651_v30 }
 0x53f   :  { %v1840_v31 = vpop.eup %1839 }
 0x540   :  { %v1084_v33 = vadd.f32 1.0, %v1840_v31  ;;  %v1842_v34 = vpop.eup %1841 }
 0x541   :  { %v1085_v35 = vadd.f32 1.0, %v1842_v34  ;;  %v1844_v36 = vpop.eup %1843 }
 0x542   :  { %1847 = vrcp.f32 %v1084_v33  ;;  %v1846_v37 = vpop.eup %1845 }
 0x543   :  { %1849 = vrcp.f32 %v1085_v35  ;;  %v1086_v48 = vadd.f32 1.0, %v1846_v37 }
 0x545   :  { %1851 = vrcp.f32 %v1086_v48 }
 0x54c   :  { %v1848_v38 = vpop.eup %1847 }
 0x54d   :  { %v1095_v32 = vmul.f32 %v1848_v38, %v1844_v36  ;;  %v1850_v52 = vpop.eup %1849 }
 0x54e   :  { %v1094_v50 = vmul.f32 %v1850_v52, %v2463_v59  ;;  %v2571_v59 = vld [vmem:[#allocation3 + $0xac] ss:$16 sps:$4 sm:$0xff]  }
 0x54f   :  { %v1852_v53 = vpop.eup %1851 }
 0x550   :  { %v2509_v51 = vadd.f32 %v1095_v32, %v1094_v50 }
 0x552   :  { %1853 = vtanh.f32 %v2509_v51 }
 0x55c   :  { %v1854_v0 = vpop.eup %1853 }
 0x55d   :  { %v1098_v54 = vmul.f32 %v1854_v0, %v1852_v53 }
 0x55f   :  { %v1106_v55 = vpack.c.bf16 %v1098_v54, %v1098_v54 }
 0x561   :  { %1140 = vmatmul.mubr.bf16.vlgmr.msra.gmra.mrb[36].mxu0 %v1106_v55  ;;  %1181 = vmatmul.mubr.bf16.vlgmr.msra.gmra.mrb[36].mxu1 %v1106_v55 }
 0x562   :  { %1226 = vmatpush1.bf16.msra.mxu0 %v2512_v56  ;;  %1267 = vmatpush1.bf16.msra.mxu1 %v2515_v45 }
 0x563   :  { %1227 = vmatprep.subr.bf16.mxu0 %v2518_v58  ;;  %1268 = vmatprep.subr.bf16.mxu1 %v2521_v60 }
 0x564   :  { %1257 = vmatprep.mubr.bf16.mxu0 %v2698_v43  ;;  %1298 = vmatprep.mubr.bf16.mxu1 %v2698_v43 }
 0x566   :  { %1228 = vmatpush1.bf16.msra.mxu0 %v2526_v62  ;;  %1269 = vmatpush1.bf16.msra.mxu1 %v2529_v61 }
 0x567   :  { %1229 = vmatprep.subr.bf16.mxu0 %v2532_v6  ;;  %1270 = vmatprep.subr.bf16.mxu1 %v2535_v7 }
 0x56a   :  { %1230 = vmatpush1.bf16.msra.mxu0 %v2538_v3  ;;  %1271 = vmatpush1.bf16.msra.mxu1 %v2541_v5 }
 0x56b   :  { %1231 = vmatprep.subr.bf16.mxu0 %v2544_v25  ;;  %1272 = vmatprep.subr.bf16.mxu1 %v2547_v63 }
 0x56e   :  { %1232 = vmatpush1.bf16.msra.mxu0 %v2550_v4  ;;  %1273 = vmatpush1.bf16.msra.mxu1 %v2553_v41 }
 0x56f   :  { %1233 = vmatprep.subr.bf16.mxu0 %v2556_v14  ;;  %1274 = vmatprep.subr.bf16.mxu1 %v2559_v44 }
 0x572   :  { %1234 = vmatpush1.bf16.msra.mxu0 %v2562_v47  ;;  %1275 = vmatpush1.bf16.msra.mxu1 %v2565_v42 }
 0x573   :  { %1235 = vmatprep.subr.bf16.mxu0 %v2568_v46  ;;  %1276 = vmatprep.subr.bf16.mxu1 %v2571_v59 }
 0x576   :  { %1236 = vmatpush1.bf16.msra.mxu0 %v2574_v57  ;;  %1277 = vmatpush1.bf16.msra.mxu1 %v2577_v1 }
 0x577   :  { %1237 = vmatprep.subr.bf16.mxu0 %v2580_v2  ;;  %1278 = vmatprep.subr.bf16.mxu1 %v2583_v49 }
 0x57a   :  { %1238 = vmatpush1.bf16.msra.mxu0 %v2586_v10  ;;  %1279 = vmatpush1.bf16.msra.mxu1 %v2589_v11 }
 0x57b   :  { %1239 = vmatprep.subr.bf16.mxu0 %v2592_v12  ;;  %1280 = vmatprep.subr.bf16.mxu1 %v2595_v13 }
 0x57e   :  { %1240 = vmatpush1.bf16.msra.mxu0 %v2200_v39  ;;  %1281 = vmatpush1.bf16.msra.mxu1 %v2208_v40 }
 0x57f   :  { %1343 = vmatprep.subr.bf16.mxu0 %v2498_v8  ;;  %1384 = vmatprep.subr.bf16.mxu1 %v2501_v9 }
 0x634   :  { %v1141_v15 = vpop.f32.mrb[36].mxu0  ;;  %v1182_v16 = vpop.f32.mrb[36].mxu1 }
 0x635   :  { %v1189_v18 = vadd.f32 %v1141_v15, %v2708_v17  ;;  %v1191_v20 = vadd.f32 %v1182_v16, %v2709_v19  ;;  %v1143_v21 = vpop.f32.mrb[37].mxu0  ;;  %v1184_v22 = vpop.f32.mrb[37].mxu1 }
 0x636   :  { %v1190_v24 = vadd.f32 %v1143_v21, %v2710_v23  ;;  %v1192_v27 = vadd.f32 %v1184_v22, %v2711_v26  ;;  %v1145_v28 = vpop.f32.mrb[38].mxu0  ;;  %v1186_v39 = vpop.f32.mrb[38].mxu1  ;;  %v1767_v23 = vld [vmem:[#allocation6] sm:$0xff]   ;;  %v1768_v26 = vld [vmem:[#allocation6 + $0x8] sm:$0xff]  }
 0x637   :  { %v1652_v29 = vmul.f32 -1.442695, %v1189_v18  ;;  %v1146_v40 = vpop.f32.mrb[39].mxu0  ;;  %v1187_v30 = vpop.f32.mrb[39].mxu1  ;;  %v1654_v9 = vmul.f32 -1.442695, %v1191_v20 }
 0x638   :  { %v1653_v8 = vmul.f32 -1.442695, %v1190_v24  ;;  %v2014_v24 = vmov 0.0   ;;  %v1770_v28 = vld [vmem:[#allocation6 + $0x18] sm:$0xff]   ;;  %v1771_v39 = vld [vmem:[#allocation6 + $0x20] sm:$0xff]   ;;  %v1773_v40 = vld [vmem:[#allocation6 + $0x30] sm:$0xff]  }
 0x639   :  { %1855 = vpow2.f32 %v1652_v29  ;;  %v1772_v29 = vld [vmem:[#allocation6 + $0x28] sm:$0xff]   ;;  %v1774_v30 = vld [vmem:[#allocation6 + $0x38] sm:$0xff]  }
 0x63a   :  { %1857 = vpow2.f32 %v1653_v8 }
 0x63b   :  { %1859 = vtanh.f32 %v1192_v27  ;;  %v1769_v27 = vld [vmem:[#allocation6 + $0x10] sm:$0xff]  }
 0x63c   :  { %1861 = vpow2.f32 %v1654_v9 }
 0x643   :  { %v1856_v31 = vpop.eup %1855 }
 0x644   :  { %v1202_v33 = vadd.f32 1.0, %v1856_v31  ;;  %v1858_v34 = vpop.eup %1857  ;;  %v2716_v31 = vld [vmem:[#allocation29_spill] sm:$0xff] }
 0x645   :  { %v1203_v35 = vadd.f32 1.0, %v1858_v34  ;;  %v1860_v36 = vpop.eup %1859  ;;  %v2717_v34 = vld [vmem:[#allocation30_spill] sm:$0xff] }
 0x646   :  { %1863 = vrcp.f32 %v1202_v33  ;;  %v1862_v37 = vpop.eup %1861 }
 0x647   :  { %1865 = vrcp.f32 %v1203_v35  ;;  %v1204_v48 = vadd.f32 1.0, %v1862_v37 }
 0x649   :  { %1867 = vrcp.f32 %v1204_v48 }
 0x650   :  { %v1864_v38 = vpop.eup %1863 }
 0x651   :  { %v1213_v32 = vmul.f32 %v1864_v38, %v1860_v36  ;;  %v1866_v52 = vpop.eup %1865  ;;  %v2718_v38 = vld [vmem:[#allocation31_spill] sm:$0xff] }
 0x652   :  { %v1212_v50 = vmul.f32 %v1866_v52, %v2509_v51  ;;  %v1934_v51 = vld [vmem:[#allocation3 + $0xe8] ss:$16 sps:$4 sm:$0xff]  }
 0x653   :  { %v1868_v0 = vpop.eup %1867  ;;  %v2719_v52 = vld [vmem:[#allocation32_spill] sm:$0xff] }
 0x654   :  { %v2607_v53 = vadd.f32 %v1213_v32, %v1212_v50 }
 0x656   :  { %1869 = vtanh.f32 %v2607_v53 }
 0x660   :  { %v1870_v54 = vpop.eup %1869 }
 0x661   :  { %v1216_v55 = vmul.f32 %v1870_v54, %v1868_v0 }
 0x663   :  { %v1224_v15 = vpack.c.bf16 %v1216_v55, %v1216_v55 }
 0x665   :  { %1258 = vmatmul.mubr.bf16.vlgmr.msra.gmra.mrb[40].mxu0 %v1224_v15  ;;  %1299 = vmatmul.mubr.bf16.vlgmr.msra.gmra.mrb[40].mxu1 %v1224_v15 }
 0x666   :  { %1344 = vmatpush1.bf16.msra.mxu0 %v2512_v56  ;;  %1385 = vmatpush1.bf16.msra.mxu1 %v2515_v45 }
 0x667   :  { %1345 = vmatprep.subr.bf16.mxu0 %v2518_v58  ;;  %1386 = vmatprep.subr.bf16.mxu1 %v2521_v60  ;;  %v2712_v58 = vld [vmem:[#allocation25_spill] sm:$0xff] }
 0x668   :  { %1375 = vmatprep.mubr.bf16.mxu0 %v2698_v43  ;;  %1416 = vmatprep.mubr.bf16.mxu1 %v2698_v43  ;;  %v1933_v43 = vld [vmem:[#allocation3 + $0xe0] ss:$16 sps:$4 sm:$0xff]  }
 0x66a   :  { %1346 = vmatpush1.bf16.msra.mxu0 %v2526_v62  ;;  %1387 = vmatpush1.bf16.msra.mxu1 %v2529_v61  ;;  %v2713_v62 = vld [vmem:[#allocation26_spill] sm:$0xff] }
 0x66b   :  { %1347 = vmatprep.subr.bf16.mxu0 %v2532_v6  ;;  %1388 = vmatprep.subr.bf16.mxu1 %v2535_v7 }
 0x66e   :  { %1348 = vmatpush1.bf16.msra.mxu0 %v2538_v3  ;;  %1389 = vmatpush1.bf16.msra.mxu1 %v2541_v5  ;;  %v2714_v3 = vld [vmem:[#allocation27_spill] sm:$0xff] }
 0x66f   :  { %1349 = vmatprep.subr.bf16.mxu0 %v2544_v25  ;;  %1390 = vmatprep.subr.bf16.mxu1 %v2547_v63  ;;  %v2715_v25 = vld [vmem:[#allocation28_spill] sm:$0xff] }
 0x672   :  { %1350 = vmatpush1.bf16.msra.mxu0 %v2550_v4  ;;  %1391 = vmatpush1.bf16.msra.mxu1 %v2553_v41 }
 0x673   :  { %1351 = vmatprep.subr.bf16.mxu0 %v2556_v14  ;;  %1392 = vmatprep.subr.bf16.mxu1 %v2559_v44 }
 0x676   :  { %1352 = vmatpush1.bf16.msra.mxu0 %v2562_v47  ;;  %1393 = vmatpush1.bf16.msra.mxu1 %v2565_v42 }
 0x677   :  { %1353 = vmatprep.subr.bf16.mxu0 %v2568_v46  ;;  %1394 = vmatprep.subr.bf16.mxu1 %v2571_v59 }
 0x67a   :  { %1354 = vmatpush1.bf16.msra.mxu0 %v2574_v57  ;;  %1395 = vmatpush1.bf16.msra.mxu1 %v2577_v1 }
 0x67b   :  { %1355 = vmatprep.subr.bf16.mxu0 %v2580_v2  ;;  %1396 = vmatprep.subr.bf16.mxu1 %v2583_v49 }
 0x67e   :  { %1356 = vmatpush1.bf16.msra.mxu0 %v2586_v10  ;;  %1397 = vmatpush1.bf16.msra.mxu1 %v2589_v11 }
 0x67f   :  { %1357 = vmatprep.subr.bf16.mxu0 %v2592_v12  ;;  %1398 = vmatprep.subr.bf16.mxu1 %v2595_v13 }
 0x682   :  { %1358 = vmatpush1.bf16.msra.mxu0 %v1933_v43  ;;  %1399 = vmatpush1.bf16.msra.mxu1 %v1934_v51 }
 0x683   :  { %1679 = vmatprep.subr.bf16.mxu0 %v2014_v24 }
 0x738   :  { %v1259_v56 = vpop.f32.mrb[40].mxu0  ;;  %v1300_v45 = vpop.f32.mrb[40].mxu1 }
 0x739   :  { %v1307_v60 = vadd.f32 %v1259_v56, %v2712_v58  ;;  %v1309_v61 = vadd.f32 %v1300_v45, %v2713_v62  ;;  %v1261_v6 = vpop.f32.mrb[41].mxu0  ;;  %v1302_v7 = vpop.f32.mrb[41].mxu1 }
 0x73a   :  { %v1308_v5 = vadd.f32 %v1261_v6, %v2714_v3  ;;  %v1310_v63 = vadd.f32 %v1302_v7, %v2715_v25  ;;  %v1263_v4 = vpop.f32.mrb[42].mxu0  ;;  %v1304_v41 = vpop.f32.mrb[42].mxu1 }
 0x73b   :  { %v1655_v14 = vmul.f32 -1.442695, %v1307_v60  ;;  %v1264_v44 = vpop.f32.mrb[43].mxu0  ;;  %v1305_v47 = vpop.f32.mrb[43].mxu1  ;;  %v1657_v46 = vmul.f32 -1.442695, %v1309_v61 }
 0x73c   :  { %v1656_v42 = vmul.f32 -1.442695, %v1308_v5  ;;  %v1661_v44 = vld [vmem:[%s2673_s5] ss:$0 sm:$0xff] }
 0x73d   :  { %1871 = vpow2.f32 %v1655_v14 }
 0x73e   :  { %1873 = vpow2.f32 %v1656_v42 }
 0x73f   :  { %1875 = vtanh.f32 %v1310_v63 }
 0x740   :  { %1877 = vpow2.f32 %v1657_v46 }
 0x747   :  { %v1872_v59 = vpop.eup %1871 }
 0x748   :  { %v1320_v57 = vadd.f32 1.0, %v1872_v59  ;;  %v1874_v1 = vpop.eup %1873 }
 0x749   :  { %v1321_v2 = vadd.f32 1.0, %v1874_v1  ;;  %v1876_v49 = vpop.eup %1875 }
 0x74a   :  { %1879 = vrcp.f32 %v1320_v57  ;;  %v1878_v10 = vpop.eup %1877 }
 0x74b   :  { %1881 = vrcp.f32 %v1321_v2  ;;  %v1322_v16 = vadd.f32 1.0, %v1878_v10 }
 0x74d   :  { %1883 = vrcp.f32 %v1322_v16 }
 0x754   :  { %v1880_v11 = vpop.eup %1879 }
 0x755   :  { %v1331_v12 = vmul.f32 %v1880_v11, %v1876_v49  ;;  %v1882_v13 = vpop.eup %1881 }
 0x756   :  { %v1330_v17 = vmul.f32 %v1882_v13, %v2607_v53 }
 0x757   :  { %v1884_v19 = vpop.eup %1883 }
 0x758   :  { %v2645_v18 = vadd.f32 %v1331_v12, %v1330_v17 }
 0x75a   :  { %1885 = vtanh.f32 %v2645_v18 }
 0x764   :  { %v1886_v20 = vpop.eup %1885 }
 0x765   :  { %v1334_v21 = vmul.f32 %v1886_v20, %v1884_v19 }
 0x767   :  { %v1342_v22 = vpack.c.bf16 %v1334_v21, %v1334_v21 }
 0x769   :  { %1376 = vmatmul.mubr.bf16.vlgmr.msra.gmra.mrb[44].mxu0 %v1342_v22  ;;  %1417 = vmatmul.mubr.bf16.vlgmr.msra.gmra.mrb[44].mxu1 %v1342_v22 }
 0x76a   :  { %1680 = vmatpush3.bf16.msra.mxu0 %v1767_v23  ;;  %1695 = vmatprep.mubr.msk.bf16.mxu0 %vm2015_vm1, %v2014_v24 }
 0x76b   :  { %1681 = vmatprep.subr.bf16.mxu0 %v2014_v24 }
 0x76e   :  { %1682 = vmatpush3.bf16.msra.mxu0 %v1768_v26 }
 0x76f   :  { %1683 = vmatprep.subr.bf16.mxu0 %v2014_v24 }
 0x772   :  { %1684 = vmatpush3.bf16.msra.mxu0 %v1769_v27 }
 0x773   :  { %1685 = vmatprep.subr.bf16.mxu0 %v2014_v24 }
 0x776   :  { %1686 = vmatpush3.bf16.msra.mxu0 %v1770_v28 }
 0x777   :  { %1687 = vmatprep.subr.bf16.mxu0 %v2014_v24 }
 0x77a   :  { %1688 = vmatpush3.bf16.msra.mxu0 %v1771_v39 }
 0x77b   :  { %1689 = vmatprep.subr.bf16.mxu0 %v2014_v24 }
 0x77e   :  { %1690 = vmatpush3.bf16.msra.mxu0 %v1772_v29 }
 0x77f   :  { %1691 = vmatprep.subr.bf16.mxu0 %v2014_v24 }
 0x782   :  { %1692 = vmatpush3.bf16.msra.mxu0 %v1773_v40 }
 0x783   :  { %1693 = vmatprep.subr.bf16.mxu0 %v2014_v24 }
 0x786   :  { %1694 = vmatpush3.bf16.msra.mxu0 %v1774_v30 }
 0x83c   :  { %v1377_v8 = vpop.f32.mrb[44].mxu0  ;;  %v1418_v9 = vpop.f32.mrb[44].mxu1 }
 0x83d   :  { %v1425_v33 = vadd.f32 %v1377_v8, %v2716_v31  ;;  %v1427_v35 = vadd.f32 %v1418_v9, %v2717_v34  ;;  %v1379_v36 = vpop.f32.mrb[45].mxu0  ;;  %v1420_v37 = vpop.f32.mrb[45].mxu1 }
 0x83e   :  { %v1426_v32 = vadd.f32 %v1379_v36, %v2718_v38  ;;  %v1428_v48 = vadd.f32 %v1420_v37, %v2719_v52  ;;  %v1381_v50 = vpop.f32.mrb[46].mxu0  ;;  %v1422_v53 = vpop.f32.mrb[46].mxu1 }
 0x83f   :  { %v1658_v0 = vmul.f32 -1.442695, %v1425_v33  ;;  %v1382_v54 = vpop.f32.mrb[47].mxu0  ;;  %v1423_v55 = vpop.f32.mrb[47].mxu1  ;;  %v1660_v43 = vmul.f32 -1.442695, %v1427_v35 }
 0x840   :  { %v1659_v15 = vmul.f32 -1.442695, %v1426_v32 }
 0x841   :  { %1887 = vpow2.f32 %v1658_v0 }
 0x842   :  { %1889 = vpow2.f32 %v1659_v15 }
 0x843   :  { %1891 = vtanh.f32 %v1428_v48 }
 0x844   :  { %1893 = vpow2.f32 %v1660_v43 }
 0x84b   :  { %v1888_v51 = vpop.eup %1887 }
 0x84c   :  { %v1438_v56 = vadd.f32 1.0, %v1888_v51  ;;  %v1890_v45 = vpop.eup %1889 }
 0x84d   :  { %v1439_v58 = vadd.f32 1.0, %v1890_v45  ;;  %v1892_v60 = vpop.eup %1891 }
 0x84e   :  { %1895 = vrcp.f32 %v1438_v56  ;;  %v1894_v62 = vpop.eup %1893 }
 0x84f   :  { %1897 = vrcp.f32 %v1439_v58  ;;  %v1440_v3 = vadd.f32 1.0, %v1894_v62 }
 0x851   :  { %1899 = vrcp.f32 %v1440_v3 }
 0x858   :  { %v1896_v61 = vpop.eup %1895 }
 0x859   :  { %v1449_v6 = vmul.f32 %v1896_v61, %v1892_v60  ;;  %v1898_v7 = vpop.eup %1897 }
 0x85a   :  { %v1448_v5 = vmul.f32 %v1898_v7, %v2645_v18 }
 0x85b   :  { %v1900_v63 = vpop.eup %1899 }
 0x85c   :  { %v1450_v25 = vadd.f32 %v1449_v6, %v1448_v5 }
 0x85e   :  { %1901 = vtanh.f32 %v1450_v25 }
 0x868   :  { %v1902_v4 = vpop.eup %1901 }
 0x869   :  { %v1452_v41 = vmul.f32 %v1902_v4, %v1900_v63 }
 0x86b   :  { %v1453_v14 = vpack.c.bf16 %v1452_v41, %v1452_v41 }
 0x86d   :  { %1696 = vmatmul.mubr.bf16.vlgmr.msra.gmra.mrb[48].mxu0 %v1453_v14 }
 0x940   :  { %v1559_v47 = vpop.f32.mrb[48].mxu0 }
 0x941   :  { %v1560_v42 = vadd.f32 %v1661_v44, %v1559_v47  ;;  %v1697_v46 = vpop.f32.mrb[49].mxu0 }
 0x942   :  { %v1562_v59 = vpop.f32.mrb[50].mxu0 }
 0x943   :  { %1565 = vst [vmem:[#allocation8] sm:$0xff] %v1560_v42  ;;  %v1698_v57 = vpop.f32.mrb[51].mxu0 }
 0x944   :  { %1990 = shalt.err (!%p1987_p6)
}
 0x945   :  { %s1991_s5 = scalar_lea.hbm %s2674_s6, 128 }
 0x946   :  { %p1992_p7 = scmp.ne.s32.totalorder %s2674_s6, %s1991_s5  ;;  %p1995_p8 = scmp.lt.u32.totalorder %s1991_s5, %s2674_s6 }
 0x948   :  { %p1997_p9 = pnand %p1995_p8, %p1992_p7 }
 0x94a   :  { %2000 = shalt.err (!%p1997_p9)
}
 0x94b   :  { %1575 = dma.vmem_to_hbm [thread:$0]  %s1573_s17, 128, %s2674_s6, [#allocation5]  }
 0x94c   :  { %2005 = dma.done.wait [#allocation5], 128  }
 0x94d   :  { %2006 = vsyncadd [#allocation5], 4294967168 }
 0x94e   :  { %1579 = vsyncpa [#allocation4], 1 }
 0x94f   :  { %1580 = vsyncpa [#allocation7], 1 }
 0x950   :  { %1581 = vsyncpa [#allocation5], 1 }

</bundles_post_ra>
